<compile_context>
chip_gen: v5e
topology: v5e:2x2
jax: 0.10.0
libtpu: 0.0.40
codegen_flags: <defaults>
</compile_context>

<pallas_src>
import functools

import jax
import jax.numpy as jnp
import numpy as np
from jax import lax
from jax.experimental import pallas as pl
from jax.experimental.pallas import tpu as pltpu


def _round_up(x, m):
    return ((x + m - 1) // m) * m


# ----------------------------- Pallas kernel --------------------------------
def _duo_stem_kernel(pat_ref, wsp_ref, wt_ref, bias_ref, out_ref, sp_ref, *, kp, kt):
    # pat_ref : (Tp*Kp, TP)    bf16  frame-major patches (temporal halo + K->Kp pad baked in)
    # wsp_ref : (Cout, Kp)     bf16  spatial 3x3 conv weight with BN scale folded in
    # wt_ref  : (KT, Cout, 1)  f32   depthwise temporal taps (applied post-MXU in f32)
    # bias_ref: (Cout, 1)      f32   folded BN bias (beta - mean*scale)
    # out_ref : (T, Cout, TP)  bf16/f32 lane-dense output tile
    # sp_ref  : (Tp, Cout, TP) f32   VMEM scratch with the per-frame spatial conv result
    T = out_ref.shape[0]
    Cout, TP = out_ref.shape[1], out_ref.shape[2]
    Tp = sp_ref.shape[0]

    wsp = wsp_ref[...]                                     # (Cout, Kp)
    # Spatial conv: one small MXU matmul per halo-padded frame (Kp-wide contraction,
    # ~KT x fewer MXU FLOPs than the previous fused KT*Kp contraction per output frame).
    for t in range(Tp):
        sp_ref[t] = jnp.dot(wsp, pat_ref[pl.ds(t * kp, kp), :],
                            preferred_element_type=jnp.float32)

    wt = wt_ref[...]                                       # (KT, Cout, 1) f32
    # Hoisted once: JAX does not CSE broadcast_in_dim inside the unrolled loop.
    bias_b = jnp.broadcast_to(bias_ref[...], (Cout, TP))

    # Depthwise temporal conv (KT taps) + BN bias + ReLU on the VPU.
    for t in range(T):
        acc = bias_b
        for j in range(kt):
            acc = acc + wt[j] * sp_ref[t + j]              # (Cout,1) * (Cout,TP)
        out_ref[t] = jnp.maximum(acc, 0.0).astype(out_ref.dtype)


# ------------------------------ JAX wrapper ----------------------------------
def _pick_tile_p(lanes, max_tile_p):
    """Largest lane tile <= max_tile_p (multiple of 128); keep >= 2 lane tiles when
    possible so grid=(2_stems, n_lane_tiles) has >= 4 steps (two v7x TensorCores)."""
    assert max_tile_p % 128 == 0
    lr = _round_up(lanes, 128)
    n = max(2, pl.cdiv(lr, max_tile_p)) if lr >= 256 else 1
    return min(max_tile_p, _round_up(pl.cdiv(lr, n), 128))


def _im2col_patches(x, kt, kp):
    """x: (2, N, Cin, T, H, W) f32 -> bf16 patches (2, Tp*Kp, N*P) and geometry."""
    S, N, Cin, T, H, W = x.shape
    KH = KW = 3
    pad_t = (kt - 1) // 2
    Ho, Wo = H // 2, W // 2                                # stride 2, pad 1, kernel 3
    P, K = Ho * Wo, KH * KW * Cin
    Tp = T + 2 * pad_t

    xc = jnp.transpose(x, (0, 1, 3, 4, 5, 2))              # (S, N, T, H, W, Cin)
    # Pad the *small* input (temporal halo + spatial conv pad) before im2col.
    # Temporal zero-pad before the spatial conv is exact because that conv has no bias.
    xp = jnp.pad(xc, ((0, 0), (0, 0), (pad_t, pad_t), (1, 1), (1, 1), (0, 0)))
    cols = []
    for i in range(KH):
        for j in range(KW):
            cols.append(xp[:, :, :, i:i + 2 * Ho:2, j:j + 2 * Wo:2, :])  # (S,N,Tp,Ho,Wo,Cin)
    pat = jnp.stack(cols, axis=3)                          # (S, N, Tp, 9, Ho, Wo, Cin)
    pat = jnp.transpose(pat, (0, 2, 3, 6, 1, 4, 5))        # (S, Tp, 9, Cin, N, Ho, Wo)
    pat = pat.reshape(S, Tp, K, N * P)
    pat = jnp.pad(pat, ((0, 0), (0, 0), (0, kp - K), (0, 0)))
    pat = pat.reshape(S, Tp * kp, N * P).astype(jnp.bfloat16)
    return pat, (Ho, Wo, P, Tp)


def _fold_stem_params(params, eps, K, kp):
    """Fold BN scale into the spatial conv weight; keep temporal taps & bias in f32."""
    w_xy, w_t = params["w_xy"], params["w_t"]              # (Cout,Cin,1,3,3), (Cout,1,KT,1,1)
    Cout = w_xy.shape[0]
    # spatial weight as (K, Cout), k = (i*KW + j)*Cin + ci  (matches im2col ordering)
    wmat = jnp.transpose(w_xy[:, :, 0], (2, 3, 1, 0)).reshape(K, Cout)
    scale = params["gamma"] / jnp.sqrt(params["var"] + eps)
    bias = params["beta"] - params["mean"] * scale
    wsp = jnp.transpose(wmat * scale[None, :], (1, 0))     # (Cout, K), BN scale folded
    wsp = jnp.pad(wsp, ((0, 0), (0, kp - K))).astype(jnp.bfloat16)
    wt = jnp.transpose(w_t[:, 0, :, 0, 0], (1, 0))[:, :, None]   # (KT, Cout, 1)
    return wsp, wt.astype(jnp.float32), bias.reshape(Cout, 1).astype(jnp.float32)


def duo_stem_forward(x_pair, params_c, params_f, *, eps=1e-5,
                     max_tile_p=1024, out_dtype=jnp.bfloat16):
    """DuoStem.forward: (x_c, x_f) -> (out_c, out_f).  x_*: (N, Cin, T, H, W) f32.

    out_dtype defaults to bf16 (halves output HBM writeback on this memory-bound
    kernel); pass jnp.float32 to reproduce the PyTorch output dtype exactly.
    """
    x_c, x_f = x_pair[0], x_pair[1]
    assert x_c.shape == x_f.shape
    N, Cin, T, H, W = x_c.shape
    KT = params_c["w_t"].shape[2]
    K = 3 * 3 * Cin
    Kp = _round_up(K, 16)                                  # bf16 sublane tile
    Cout = params_c["w_xy"].shape[0]

    # One im2col pass for both stems; batch folded into the lane axis.
    x_both = jnp.stack([x_c, x_f], axis=0)                 # (2, N, Cin, T, H, W)
    pat, (Ho, Wo, P, Tp) = _im2col_patches(x_both, KT, Kp)
    L = N * P
    tile_p = _pick_tile_p(L, max_tile_p)
    Lpad = _round_up(L, tile_p)
    if Lpad != L:
        pat = jnp.pad(pat, ((0, 0), (0, 0), (0, Lpad - L)))
    n_l = Lpad // tile_p

    wsp_c, wt_c, b_c = _fold_stem_params(params_c, eps, K, Kp)
    wsp_f, wt_f, b_f = _fold_stem_params(params_f, eps, K, Kp)
    wsp = jnp.stack([wsp_c, wsp_f], axis=0)                # (2, Cout, Kp)    bf16
    wt = jnp.stack([wt_c, wt_f], axis=0)                   # (2, KT, Cout, 1) f32
    bias = jnp.stack([b_c, b_f], axis=0)                   # (2, Cout, 1)     f32

    out_isize = jnp.dtype(out_dtype).itemsize
    # Per-step VMEM footprint: double-buffered pat/out blocks + f32 spatial scratch.
    pat_blk = Tp * Kp * tile_p * 2
    out_blk = T * Cout * tile_p * out_isize
    sp_blk = Tp * Cout * tile_p * 4
    vmem_need = 2 * pat_blk + 2 * out_blk + sp_blk + Cout * (Kp * 2 + KT * 4 + 4)
    # Raise the scoped-VMEM limit (defaults are 16/32 MiB) but stay <= v7x's 64 MiB.
    vmem_limit = int(min(max(vmem_need * 2, 32 << 20), 64 << 20))

    flops = int(2 * (2 * Tp * Cout * Kp + 2 * T * KT * Cout) * Lpad)
    bytes_acc = int(pat.size * 2 + 2 * T * Cout * Lpad * out_isize
                    + wsp.size * 2 + (wt.size + bias.size) * 4)

    kernel = functools.partial(_duo_stem_kernel, kp=Kp, kt=KT)

    out = pl.pallas_call(
        kernel,
        out_shape=jax.ShapeDtypeStruct((2, T, Cout, Lpad), out_dtype),
        grid=(2, n_l),
        in_specs=[
            pl.BlockSpec((None, Tp * Kp, tile_p), lambda s, l: (s, 0, l)),
            pl.BlockSpec((None, Cout, Kp), lambda s, l: (s, 0, 0)),
            pl.BlockSpec((None, KT, Cout, 1), lambda s, l: (s, 0, 0, 0)),
            pl.BlockSpec((None, Cout, 1), lambda s, l: (s, 0, 0)),
        ],
        out_specs=pl.BlockSpec((None, T, Cout, tile_p), lambda s, l: (s, 0, 0, l)),
        scratch_shapes=[pltpu.VMEM((Tp, Cout, tile_p), jnp.float32)],
        compiler_params=pltpu.CompilerParams(
            dimension_semantics=("parallel", "parallel"),
            vmem_limit_bytes=vmem_limit),
        cost_estimate=pl.CostEstimate(
            flops=flops, transcendentals=0, bytes_accessed=bytes_acc),
    )(pat, wsp, wt, bias)

    # (2, T, Cout, Lpad) -> drop lane padding -> NCDHW per stem (pure axis swap).
    out = out[..., :L].reshape(2, T, Cout, N, Ho, Wo)
    out = jnp.transpose(out, (0, 3, 2, 1, 4, 5))           # (2, N, Cout, T, Ho, Wo)
    return out[0], out[1]


# --------------------------- pure-JAX reference ------------------------------
def x3d_stem_reference(x, params, *, eps=1e-5):
    dn = ("NCDHW", "OIDHW", "NCDHW")
    y = lax.conv_general_dilated(
        x, params["w_xy"], window_strides=(1, 2, 2),
        padding=((0, 0), (1, 1), (1, 1)), dimension_numbers=dn,
        precision=jax.lax.Precision.HIGHEST)
    y = lax.conv_general_dilated(
        y, params["w_t"], window_strides=(1, 1, 1),
        padding=((2, 2), (0, 0), (0, 0)), dimension_numbers=dn,
        feature_group_count=params["w_t"].shape[0],
        precision=jax.lax.Precision.HIGHEST)
    scale = params["gamma"] / jnp.sqrt(params["var"] + eps)
    bias = params["beta"] - params["mean"] * scale
    y = y * scale[None, :, None, None, None] + bias[None, :, None, None, None]
    return jnp.maximum(y, 0.0)


# --------------------------------- main ---------------------------------------
if __name__ == "__main__":
    # Small but tiling-relevant shapes: N*Ho*Wo = 512 lanes -> two 256-lane tiles per
    # stem, so the (stem, lane) grid has 4 parallel steps.
    N, Cin, T, H, W = 2, 3, 8, 32, 32
    Cout = 24                                              # X3D stem default width

    key = jax.random.PRNGKey(0)
    k_xc, k_xf, *pk = jax.random.split(key, 14)

    def init_stem_params(keys):
        return {
            "w_xy": 0.1 * jax.random.normal(keys[0], (Cout, Cin, 1, 3, 3), jnp.float32),
            "w_t": 0.1 * jax.random.normal(keys[1], (Cout, 1, 5, 1, 1), jnp.float32),
            "gamma": 1.0 + 0.1 * jax.random.normal(keys[2], (Cout,), jnp.float32),
            "beta": 0.1 * jax.random.normal(keys[3], (Cout,), jnp.float32),
            "mean": 0.1 * jax.random.normal(keys[4], (Cout,), jnp.float32),
            "var": 0.5 + jnp.abs(jax.random.normal(keys[5], (Cout,), jnp.float32)),
        }

    params_c = init_stem_params(pk[0:6])
    params_f = init_stem_params(pk[6:12])

    x_c = jax.random.normal(k_xc, (N, Cin, T, H, W), jnp.float32)
    x_f = jax.random.normal(k_xf, (N, Cin, T, H, W), jnp.float32)

    out_c, out_f = duo_stem_forward((x_c, x_f), params_c, params_f)
    out_c = jax.block_until_ready(out_c)
    out_f = jax.block_until_ready(out_f)

    assert out_c.shape == (N, Cout, T, H // 2, W // 2)
    assert out_f.shape == (N, Cout, T, H // 2, W // 2)

    # Correctness vs full-f32 XLA conv reference.  The kernel uses bf16 MXU operands
    # (f32 accumulation) and bf16 output storage, so use bf16-appropriate tolerances.
    ref_c = x3d_stem_reference(x_c, params_c)
    ref_f = x3d_stem_reference(x_f, params_f)
    np.testing.assert_allclose(np.asarray(out_c, dtype=np.float32), np.asarray(ref_c),
                               rtol=2e-2, atol=1e-2)
    np.testing.assert_allclose(np.asarray(out_f, dtype=np.float32), np.asarray(ref_f),
                               rtol=2e-2, atol=1e-2)

    print("KERNEL_OK")
</pallas_src>

<mosaic_0001>
module attributes {stable_mosaic.version = 11 : i64} {
  func.func @_duo_stem_kernel(%arg0: i32, %arg1: i32, %arg2: memref<1x384x256xbf16, #tpu.memory_space<vmem>>, %arg3: memref<1x24x32xbf16, #tpu.memory_space<vmem>>, %arg4: memref<1x5x24x1xf32, #tpu.memory_space<vmem>>, %arg5: memref<1x24x1xf32, #tpu.memory_space<vmem>>, %arg6: memref<1x8x24x256xbf16, #tpu.memory_space<vmem>>, %arg7: memref<12x24x256xf32, #tpu.memory_space<vmem>>) attributes {dimension_semantics = [#tpu.dimension_semantics<parallel>, #tpu.dimension_semantics<parallel>], iteration_bounds = array<i64: 2, 2>, scalar_prefetch = 0 : i64, scratch_operands = 1 : i64, tpu.core_type = #tpu.core_type<tc>, window_params = [{transform_indices = @transform_0, window_bounds = array<i64: 1, 384, 256>}, {transform_indices = @transform_1, window_bounds = array<i64: 1, 24, 32>}, {transform_indices = @transform_2, window_bounds = array<i64: 1, 5, 24, 1>}, {transform_indices = @transform_3, window_bounds = array<i64: 1, 24, 1>}, {transform_indices = @transform_4, window_bounds = array<i64: 1, 8, 24, 256>}]} {
    %c0 = arith.constant 0 : index
    %c0_0 = arith.constant 0 : index
    %c0_1 = arith.constant 0 : index
    %0 = vector.load %arg3[%c0, %c0_0, %c0_1] : memref<1x24x32xbf16, #tpu.memory_space<vmem>>, vector<1x24x32xbf16>
    %1 = vector.shape_cast %0 : vector<1x24x32xbf16> to vector<24x32xbf16>
    %c0_2 = arith.constant 0 : index
    %c0_3 = arith.constant 0 : index
    %c0_4 = arith.constant 0 : index
    %2 = vector.load %arg2[%c0_2, %c0_3, %c0_4] : memref<1x384x256xbf16, #tpu.memory_space<vmem>>, vector<1x32x256xbf16>
    %3 = vector.shape_cast %2 : vector<1x32x256xbf16> to vector<32x256xbf16>
    %cst = arith.constant dense<0.000000e+00> : vector<24x256xf32>
    %4 = tpu.matmul %1, %3, %cst {dimension_numbers = #tpu.dot_dimension_numbers<[1], [0], [0], [1], [0, 0, 1, 1], [], []>} : vector<24x32xbf16>, vector<32x256xbf16>, vector<24x256xf32> -> vector<24x256xf32>
    %c0_5 = arith.constant 0 : index
    %c0_6 = arith.constant 0 : index
    %c0_7 = arith.constant 0 : index
    %5 = vector.load %arg7[%c0_5, %c0_6, %c0_7] : memref<12x24x256xf32, #tpu.memory_space<vmem>>, vector<1x24x256xf32>
    %6 = vector.shape_cast %5 : vector<1x24x256xf32> to vector<24x256xf32>
    %7 = vector.shape_cast %4 : vector<24x256xf32> to vector<1x24x256xf32>
    tpu.vector_store %arg7[%c0_5, %c0_6, %c0_7], %7 {strides = array<i32>} : memref<12x24x256xf32, #tpu.memory_space<vmem>>, vector<1x24x256xf32>,
    %c0_8 = arith.constant 0 : index
    %c32 = arith.constant 32 : index
    %c0_9 = arith.constant 0 : index
    %8 = vector.load %arg2[%c0_8, %c32, %c0_9] : memref<1x384x256xbf16, #tpu.memory_space<vmem>>, vector<1x32x256xbf16>
    %9 = vector.shape_cast %8 : vector<1x32x256xbf16> to vector<32x256xbf16>
    %cst_10 = arith.constant dense<0.000000e+00> : vector<24x256xf32>
    %10 = tpu.matmul %1, %9, %cst_10 {dimension_numbers = #tpu.dot_dimension_numbers<[1], [0], [0], [1], [0, 0, 1, 1], [], []>} : vector<24x32xbf16>, vector<32x256xbf16>, vector<24x256xf32> -> vector<24x256xf32>
    %c1 = arith.constant 1 : index
    %c0_11 = arith.constant 0 : index
    %c0_12 = arith.constant 0 : index
    %11 = vector.load %arg7[%c1, %c0_11, %c0_12] : memref<12x24x256xf32, #tpu.memory_space<vmem>>, vector<1x24x256xf32>
    %12 = vector.shape_cast %11 : vector<1x24x256xf32> to vector<24x256xf32>
    %13 = vector.shape_cast %10 : vector<24x256xf32> to vector<1x24x256xf32>
    tpu.vector_store %arg7[%c1, %c0_11, %c0_12], %13 {strides = array<i32>} : memref<12x24x256xf32, #tpu.memory_space<vmem>>, vector<1x24x256xf32>,
    %c0_13 = arith.constant 0 : index
    %c64 = arith.constant 64 : index
    %c0_14 = arith.constant 0 : index
    %14 = vector.load %arg2[%c0_13, %c64, %c0_14] : memref<1x384x256xbf16, #tpu.memory_space<vmem>>, vector<1x32x256xbf16>
    %15 = vector.shape_cast %14 : vector<1x32x256xbf16> to vector<32x256xbf16>
    %cst_15 = arith.constant dense<0.000000e+00> : vector<24x256xf32>
    %16 = tpu.matmul %1, %15, %cst_15 {dimension_numbers = #tpu.dot_dimension_numbers<[1], [0], [0], [1], [0, 0, 1, 1], [], []>} : vector<24x32xbf16>, vector<32x256xbf16>, vector<24x256xf32> -> vector<24x256xf32>
    %c2 = arith.constant 2 : index
    %c0_16 = arith.constant 0 : index
    %c0_17 = arith.constant 0 : index
    %17 = vector.load %arg7[%c2, %c0_16, %c0_17] : memref<12x24x256xf32, #tpu.memory_space<vmem>>, vector<1x24x256xf32>
    %18 = vector.shape_cast %17 : vector<1x24x256xf32> to vector<24x256xf32>
    %19 = vector.shape_cast %16 : vector<24x256xf32> to vector<1x24x256xf32>
    tpu.vector_store %arg7[%c2, %c0_16, %c0_17], %19 {strides = array<i32>} : memref<12x24x256xf32, #tpu.memory_space<vmem>>, vector<1x24x256xf32>,
    %c0_18 = arith.constant 0 : index
    %c96 = arith.constant 96 : index
    %c0_19 = arith.constant 0 : index
    %20 = vector.load %arg2[%c0_18, %c96, %c0_19] : memref<1x384x256xbf16, #tpu.memory_space<vmem>>, vector<1x32x256xbf16>
    %21 = vector.shape_cast %20 : vector<1x32x256xbf16> to vector<32x256xbf16>
    %cst_20 = arith.constant dense<0.000000e+00> : vector<24x256xf32>
    %22 = tpu.matmul %1, %21, %cst_20 {dimension_numbers = #tpu.dot_dimension_numbers<[1], [0], [0], [1], [0, 0, 1, 1], [], []>} : vector<24x32xbf16>, vector<32x256xbf16>, vector<24x256xf32> -> vector<24x256xf32>
    %c3 = arith.constant 3 : index
    %c0_21 = arith.constant 0 : index
    %c0_22 = arith.constant 0 : index
    %23 = vector.load %arg7[%c3, %c0_21, %c0_22] : memref<12x24x256xf32, #tpu.memory_space<vmem>>, vector<1x24x256xf32>
    %24 = vector.shape_cast %23 : vector<1x24x256xf32> to vector<24x256xf32>
    %25 = vector.shape_cast %22 : vector<24x256xf32> to vector<1x24x256xf32>
    tpu.vector_store %arg7[%c3, %c0_21, %c0_22], %25 {strides = array<i32>} : memref<12x24x256xf32, #tpu.memory_space<vmem>>, vector<1x24x256xf32>,
    %c0_23 = arith.constant 0 : index
    %c128 = arith.constant 128 : index
    %c0_24 = arith.constant 0 : index
    %26 = vector.load %arg2[%c0_23, %c128, %c0_24] : memref<1x384x256xbf16, #tpu.memory_space<vmem>>, vector<1x32x256xbf16>
    %27 = vector.shape_cast %26 : vector<1x32x256xbf16> to vector<32x256xbf16>
    %cst_25 = arith.constant dense<0.000000e+00> : vector<24x256xf32>
    %28 = tpu.matmul %1, %27, %cst_25 {dimension_numbers = #tpu.dot_dimension_numbers<[1], [0], [0], [1], [0, 0, 1, 1], [], []>} : vector<24x32xbf16>, vector<32x256xbf16>, vector<24x256xf32> -> vector<24x256xf32>
    %c4 = arith.constant 4 : index
    %c0_26 = arith.constant 0 : index
    %c0_27 = arith.constant 0 : index
    %29 = vector.load %arg7[%c4, %c0_26, %c0_27] : memref<12x24x256xf32, #tpu.memory_space<vmem>>, vector<1x24x256xf32>
    %30 = vector.shape_cast %29 : vector<1x24x256xf32> to vector<24x256xf32>
    %31 = vector.shape_cast %28 : vector<24x256xf32> to vector<1x24x256xf32>
    tpu.vector_store %arg7[%c4, %c0_26, %c0_27], %31 {strides = array<i32>} : memref<12x24x256xf32, #tpu.memory_space<vmem>>, vector<1x24x256xf32>,
    %c0_28 = arith.constant 0 : index
    %c160 = arith.constant 160 : index
    %c0_29 = arith.constant 0 : index
    %32 = vector.load %arg2[%c0_28, %c160, %c0_29] : memref<1x384x256xbf16, #tpu.memory_space<vmem>>, vector<1x32x256xbf16>
    %33 = vector.shape_cast %32 : vector<1x32x256xbf16> to vector<32x256xbf16>
    %cst_30 = arith.constant dense<0.000000e+00> : vector<24x256xf32>
    %34 = tpu.matmul %1, %33, %cst_30 {dimension_numbers = #tpu.dot_dimension_numbers<[1], [0], [0], [1], [0, 0, 1, 1], [], []>} : vector<24x32xbf16>, vector<32x256xbf16>, vector<24x256xf32> -> vector<24x256xf32>
    %c5 = arith.constant 5 : index
    %c0_31 = arith.constant 0 : index
    %c0_32 = arith.constant 0 : index
    %35 = vector.load %arg7[%c5, %c0_31, %c0_32] : memref<12x24x256xf32, #tpu.memory_space<vmem>>, vector<1x24x256xf32>
    %36 = vector.shape_cast %35 : vector<1x24x256xf32> to vector<24x256xf32>
    %37 = vector.shape_cast %34 : vector<24x256xf32> to vector<1x24x256xf32>
    tpu.vector_store %arg7[%c5, %c0_31, %c0_32], %37 {strides = array<i32>} : memref<12x24x256xf32, #tpu.memory_space<vmem>>, vector<1x24x256xf32>,
    %c0_33 = arith.constant 0 : index
    %c192 = arith.constant 192 : index
    %c0_34 = arith.constant 0 : index
    %38 = vector.load %arg2[%c0_33, %c192, %c0_34] : memref<1x384x256xbf16, #tpu.memory_space<vmem>>, vector<1x32x256xbf16>
    %39 = vector.shape_cast %38 : vector<1x32x256xbf16> to vector<32x256xbf16>
    %cst_35 = arith.constant dense<0.000000e+00> : vector<24x256xf32>
    %40 = tpu.matmul %1, %39, %cst_35 {dimension_numbers = #tpu.dot_dimension_numbers<[1], [0], [0], [1], [0, 0, 1, 1], [], []>} : vector<24x32xbf16>, vector<32x256xbf16>, vector<24x256xf32> -> vector<24x256xf32>
    %c6 = arith.constant 6 : index
    %c0_36 = arith.constant 0 : index
    %c0_37 = arith.constant 0 : index
    %41 = vector.load %arg7[%c6, %c0_36, %c0_37] : memref<12x24x256xf32, #tpu.memory_space<vmem>>, vector<1x24x256xf32>
    %42 = vector.shape_cast %41 : vector<1x24x256xf32> to vector<24x256xf32>
    %43 = vector.shape_cast %40 : vector<24x256xf32> to vector<1x24x256xf32>
    tpu.vector_store %arg7[%c6, %c0_36, %c0_37], %43 {strides = array<i32>} : memref<12x24x256xf32, #tpu.memory_space<vmem>>, vector<1x24x256xf32>,
    %c0_38 = arith.constant 0 : index
    %c224 = arith.constant 224 : index
    %c0_39 = arith.constant 0 : index
    %44 = vector.load %arg2[%c0_38, %c224, %c0_39] : memref<1x384x256xbf16, #tpu.memory_space<vmem>>, vector<1x32x256xbf16>
    %45 = vector.shape_cast %44 : vector<1x32x256xbf16> to vector<32x256xbf16>
    %cst_40 = arith.constant dense<0.000000e+00> : vector<24x256xf32>
    %46 = tpu.matmul %1, %45, %cst_40 {dimension_numbers = #tpu.dot_dimension_numbers<[1], [0], [0], [1], [0, 0, 1, 1], [], []>} : vector<24x32xbf16>, vector<32x256xbf16>, vector<24x256xf32> -> vector<24x256xf32>
    %c7 = arith.constant 7 : index
    %c0_41 = arith.constant 0 : index
    %c0_42 = arith.constant 0 : index
    %47 = vector.load %arg7[%c7, %c0_41, %c0_42] : memref<12x24x256xf32, #tpu.memory_space<vmem>>, vector<1x24x256xf32>
    %48 = vector.shape_cast %47 : vector<1x24x256xf32> to vector<24x256xf32>
    %49 = vector.shape_cast %46 : vector<24x256xf32> to vector<1x24x256xf32>
    tpu.vector_store %arg7[%c7, %c0_41, %c0_42], %49 {strides = array<i32>} : memref<12x24x256xf32, #tpu.memory_space<vmem>>, vector<1x24x256xf32>,
    %c0_43 = arith.constant 0 : index
    %c256 = arith.constant 256 : index
    %c0_44 = arith.constant 0 : index
    %50 = vector.load %arg2[%c0_43, %c256, %c0_44] : memref<1x384x256xbf16, #tpu.memory_space<vmem>>, vector<1x32x256xbf16>
    %51 = vector.shape_cast %50 : vector<1x32x256xbf16> to vector<32x256xbf16>
    %cst_45 = arith.constant dense<0.000000e+00> : vector<24x256xf32>
    %52 = tpu.matmul %1, %51, %cst_45 {dimension_numbers = #tpu.dot_dimension_numbers<[1], [0], [0], [1], [0, 0, 1, 1], [], []>} : vector<24x32xbf16>, vector<32x256xbf16>, vector<24x256xf32> -> vector<24x256xf32>
    %c8 = arith.constant 8 : index
    %c0_46 = arith.constant 0 : index
    %c0_47 = arith.constant 0 : index
    %53 = vector.load %arg7[%c8, %c0_46, %c0_47] : memref<12x24x256xf32, #tpu.memory_space<vmem>>, vector<1x24x256xf32>
    %54 = vector.shape_cast %53 : vector<1x24x256xf32> to vector<24x256xf32>
    %55 = vector.shape_cast %52 : vector<24x256xf32> to vector<1x24x256xf32>
    tpu.vector_store %arg7[%c8, %c0_46, %c0_47], %55 {strides = array<i32>} : memref<12x24x256xf32, #tpu.memory_space<vmem>>, vector<1x24x256xf32>,
    %c0_48 = arith.constant 0 : index
    %c288 = arith.constant 288 : index
    %c0_49 = arith.constant 0 : index
    %56 = vector.load %arg2[%c0_48, %c288, %c0_49] : memref<1x384x256xbf16, #tpu.memory_space<vmem>>, vector<1x32x256xbf16>
    %57 = vector.shape_cast %56 : vector<1x32x256xbf16> to vector<32x256xbf16>
    %cst_50 = arith.constant dense<0.000000e+00> : vector<24x256xf32>
    %58 = tpu.matmul %1, %57, %cst_50 {dimension_numbers = #tpu.dot_dimension_numbers<[1], [0], [0], [1], [0, 0, 1, 1], [], []>} : vector<24x32xbf16>, vector<32x256xbf16>, vector<24x256xf32> -> vector<24x256xf32>
    %c9 = arith.constant 9 : index
    %c0_51 = arith.constant 0 : index
    %c0_52 = arith.constant 0 : index
    %59 = vector.load %arg7[%c9, %c0_51, %c0_52] : memref<12x24x256xf32, #tpu.memory_space<vmem>>, vector<1x24x256xf32>
    %60 = vector.shape_cast %59 : vector<1x24x256xf32> to vector<24x256xf32>
    %61 = vector.shape_cast %58 : vector<24x256xf32> to vector<1x24x256xf32>
    tpu.vector_store %arg7[%c9, %c0_51, %c0_52], %61 {strides = array<i32>} : memref<12x24x256xf32, #tpu.memory_space<vmem>>, vector<1x24x256xf32>,
    %c0_53 = arith.constant 0 : index
    %c320 = arith.constant 320 : index
    %c0_54 = arith.constant 0 : index
    %62 = vector.load %arg2[%c0_53, %c320, %c0_54] : memref<1x384x256xbf16, #tpu.memory_space<vmem>>, vector<1x32x256xbf16>
    %63 = vector.shape_cast %62 : vector<1x32x256xbf16> to vector<32x256xbf16>
    %cst_55 = arith.constant dense<0.000000e+00> : vector<24x256xf32>
    %64 = tpu.matmul %1, %63, %cst_55 {dimension_numbers = #tpu.dot_dimension_numbers<[1], [0], [0], [1], [0, 0, 1, 1], [], []>} : vector<24x32xbf16>, vector<32x256xbf16>, vector<24x256xf32> -> vector<24x256xf32>
    %c10 = arith.constant 10 : index
    %c0_56 = arith.constant 0 : index
    %c0_57 = arith.constant 0 : index
    %65 = vector.load %arg7[%c10, %c0_56, %c0_57] : memref<12x24x256xf32, #tpu.memory_space<vmem>>, vector<1x24x256xf32>
    %66 = vector.shape_cast %65 : vector<1x24x256xf32> to vector<24x256xf32>
    %67 = vector.shape_cast %64 : vector<24x256xf32> to vector<1x24x256xf32>
    tpu.vector_store %arg7[%c10, %c0_56, %c0_57], %67 {strides = array<i32>} : memref<12x24x256xf32, #tpu.memory_space<vmem>>, vector<1x24x256xf32>,
    %c0_58 = arith.constant 0 : index
    %c352 = arith.constant 352 : index
    %c0_59 = arith.constant 0 : index
    %68 = vector.load %arg2[%c0_58, %c352, %c0_59] : memref<1x384x256xbf16, #tpu.memory_space<vmem>>, vector<1x32x256xbf16>
    %69 = vector.shape_cast %68 : vector<1x32x256xbf16> to vector<32x256xbf16>
    %cst_60 = arith.constant dense<0.000000e+00> : vector<24x256xf32>
    %70 = tpu.matmul %1, %69, %cst_60 {dimension_numbers = #tpu.dot_dimension_numbers<[1], [0], [0], [1], [0, 0, 1, 1], [], []>} : vector<24x32xbf16>, vector<32x256xbf16>, vector<24x256xf32> -> vector<24x256xf32>
    %c11 = arith.constant 11 : index
    %c0_61 = arith.constant 0 : index
    %c0_62 = arith.constant 0 : index
    %71 = vector.load %arg7[%c11, %c0_61, %c0_62] : memref<12x24x256xf32, #tpu.memory_space<vmem>>, vector<1x24x256xf32>
    %72 = vector.shape_cast %71 : vector<1x24x256xf32> to vector<24x256xf32>
    %73 = vector.shape_cast %70 : vector<24x256xf32> to vector<1x24x256xf32>
    tpu.vector_store %arg7[%c11, %c0_61, %c0_62], %73 {strides = array<i32>} : memref<12x24x256xf32, #tpu.memory_space<vmem>>, vector<1x24x256xf32>,
    %c0_63 = arith.constant 0 : index
    %c0_64 = arith.constant 0 : index
    %c0_65 = arith.constant 0 : index
    %c0_66 = arith.constant 0 : index
    %74 = vector.load %arg4[%c0_63, %c0_64, %c0_65, %c0_66] : memref<1x5x24x1xf32, #tpu.memory_space<vmem>>, vector<1x5x24x1xf32>
    %75 = vector.shape_cast %74 : vector<1x5x24x1xf32> to vector<5x24x1xf32>
    %c0_67 = arith.constant 0 : index
    %c0_68 = arith.constant 0 : index
    %c0_69 = arith.constant 0 : index
    %76 = vector.load %arg5[%c0_67, %c0_68, %c0_69] : memref<1x24x1xf32, #tpu.memory_space<vmem>>, vector<1x24x1xf32>
    %77 = vector.shape_cast %76 : vector<1x24x1xf32> to vector<24x1xf32>
    %78 = vector.shape_cast %77 : vector<24x1xf32> to vector<24x1xf32>
    %79 = vector.broadcast %78 : vector<24x1xf32> to vector<24x256xf32>
    %80 = vector.extract_strided_slice %75 {offsets = [0, 0, 0], sizes = [1, 24, 1], strides = [1, 1, 1]} : vector<5x24x1xf32> to vector<1x24x1xf32>
    %81 = vector.shape_cast %80 : vector<1x24x1xf32> to vector<24x1xf32>
    %c0_70 = arith.constant 0 : index
    %c0_71 = arith.constant 0 : index
    %c0_72 = arith.constant 0 : index
    %82 = vector.load %arg7[%c0_70, %c0_71, %c0_72] : memref<12x24x256xf32, #tpu.memory_space<vmem>>, vector<1x24x256xf32>
    %83 = vector.shape_cast %82 : vector<1x24x256xf32> to vector<24x256xf32>
    %84 = vector.broadcast %81 : vector<24x1xf32> to vector<24x256xf32>
    %85 = arith.mulf %84, %83 : vector<24x256xf32>
    %86 = arith.addf %79, %85 : vector<24x256xf32>
    %87 = vector.extract_strided_slice %75 {offsets = [1, 0, 0], sizes = [1, 24, 1], strides = [1, 1, 1]} : vector<5x24x1xf32> to vector<1x24x1xf32>
    %88 = vector.shape_cast %87 : vector<1x24x1xf32> to vector<24x1xf32>
    %c1_73 = arith.constant 1 : index
    %c0_74 = arith.constant 0 : index
    %c0_75 = arith.constant 0 : index
    %89 = vector.load %arg7[%c1_73, %c0_74, %c0_75] : memref<12x24x256xf32, #tpu.memory_space<vmem>>, vector<1x24x256xf32>
    %90 = vector.shape_cast %89 : vector<1x24x256xf32> to vector<24x256xf32>
    %91 = vector.broadcast %88 : vector<24x1xf32> to vector<24x256xf32>
    %92 = arith.mulf %91, %90 : vector<24x256xf32>
    %93 = arith.addf %86, %92 : vector<24x256xf32>
    %94 = vector.extract_strided_slice %75 {offsets = [2, 0, 0], sizes = [1, 24, 1], strides = [1, 1, 1]} : vector<5x24x1xf32> to vector<1x24x1xf32>
    %95 = vector.shape_cast %94 : vector<1x24x1xf32> to vector<24x1xf32>
    %c2_76 = arith.constant 2 : index
    %c0_77 = arith.constant 0 : index
    %c0_78 = arith.constant 0 : index
    %96 = vector.load %arg7[%c2_76, %c0_77, %c0_78] : memref<12x24x256xf32, #tpu.memory_space<vmem>>, vector<1x24x256xf32>
    %97 = vector.shape_cast %96 : vector<1x24x256xf32> to vector<24x256xf32>
    %98 = vector.broadcast %95 : vector<24x1xf32> to vector<24x256xf32>
    %99 = arith.mulf %98, %97 : vector<24x256xf32>
    %100 = arith.addf %93, %99 : vector<24x256xf32>
    %101 = vector.extract_strided_slice %75 {offsets = [3, 0, 0], sizes = [1, 24, 1], strides = [1, 1, 1]} : vector<5x24x1xf32> to vector<1x24x1xf32>
    %102 = vector.shape_cast %101 : vector<1x24x1xf32> to vector<24x1xf32>
    %c3_79 = arith.constant 3 : index
    %c0_80 = arith.constant 0 : index
    %c0_81 = arith.constant 0 : index
    %103 = vector.load %arg7[%c3_79, %c0_80, %c0_81] : memref<12x24x256xf32, #tpu.memory_space<vmem>>, vector<1x24x256xf32>
    %104 = vector.shape_cast %103 : vector<1x24x256xf32> to vector<24x256xf32>
    %105 = vector.broadcast %102 : vector<24x1xf32> to vector<24x256xf32>
    %106 = arith.mulf %105, %104 : vector<24x256xf32>
    %107 = arith.addf %100, %106 : vector<24x256xf32>
    %108 = vector.extract_strided_slice %75 {offsets = [4, 0, 0], sizes = [1, 24, 1], strides = [1, 1, 1]} : vector<5x24x1xf32> to vector<1x24x1xf32>
    %109 = vector.shape_cast %108 : vector<1x24x1xf32> to vector<24x1xf32>
    %c4_82 = arith.constant 4 : index
    %c0_83 = arith.constant 0 : index
    %c0_84 = arith.constant 0 : index
    %110 = vector.load %arg7[%c4_82, %c0_83, %c0_84] : memref<12x24x256xf32, #tpu.memory_space<vmem>>, vector<1x24x256xf32>
    %111 = vector.shape_cast %110 : vector<1x24x256xf32> to vector<24x256xf32>
    %112 = vector.broadcast %109 : vector<24x1xf32> to vector<24x256xf32>
    %113 = arith.mulf %112, %111 : vector<24x256xf32>
    %114 = arith.addf %107, %113 : vector<24x256xf32>
    %cst_85 = arith.constant 0.000000e+00 : f32
    %115 = vector.broadcast %cst_85 : f32 to vector<24x256xf32>
    %116 = arith.maximumf %114, %115 : vector<24x256xf32>
    %117 = arith.truncf %116 : vector<24x256xf32> to vector<24x256xbf16>
    %c0_86 = arith.constant 0 : index
    %c0_87 = arith.constant 0 : index
    %c0_88 = arith.constant 0 : index
    %c0_89 = arith.constant 0 : index
    %118 = vector.load %arg6[%c0_86, %c0_87, %c0_88, %c0_89] : memref<1x8x24x256xbf16, #tpu.memory_space<vmem>>, vector<1x1x24x256xbf16>
    %119 = vector.shape_cast %118 : vector<1x1x24x256xbf16> to vector<24x256xbf16>
    %120 = vector.shape_cast %117 : vector<24x256xbf16> to vector<1x1x24x256xbf16>
    tpu.vector_store %arg6[%c0_86, %c0_87, %c0_88, %c0_89], %120 {strides = array<i32>} : memref<1x8x24x256xbf16, #tpu.memory_space<vmem>>, vector<1x1x24x256xbf16>,
    %121 = vector.extract_strided_slice %75 {offsets = [0, 0, 0], sizes = [1, 24, 1], strides = [1, 1, 1]} : vector<5x24x1xf32> to vector<1x24x1xf32>
    %122 = vector.shape_cast %121 : vector<1x24x1xf32> to vector<24x1xf32>
    %c1_90 = arith.constant 1 : index
    %c0_91 = arith.constant 0 : index
    %c0_92 = arith.constant 0 : index
    %123 = vector.load %arg7[%c1_90, %c0_91, %c0_92] : memref<12x24x256xf32, #tpu.memory_space<vmem>>, vector<1x24x256xf32>
    %124 = vector.shape_cast %123 : vector<1x24x256xf32> to vector<24x256xf32>
    %125 = vector.broadcast %122 : vector<24x1xf32> to vector<24x256xf32>
    %126 = arith.mulf %125, %124 : vector<24x256xf32>
    %127 = arith.addf %79, %126 : vector<24x256xf32>
    %128 = vector.extract_strided_slice %75 {offsets = [1, 0, 0], sizes = [1, 24, 1], strides = [1, 1, 1]} : vector<5x24x1xf32> to vector<1x24x1xf32>
    %129 = vector.shape_cast %128 : vector<1x24x1xf32> to vector<24x1xf32>
    %c2_93 = arith.constant 2 : index
    %c0_94 = arith.constant 0 : index
    %c0_95 = arith.constant 0 : index
    %130 = vector.load %arg7[%c2_93, %c0_94, %c0_95] : memref<12x24x256xf32, #tpu.memory_space<vmem>>, vector<1x24x256xf32>
    %131 = vector.shape_cast %130 : vector<1x24x256xf32> to vector<24x256xf32>
    %132 = vector.broadcast %129 : vector<24x1xf32> to vector<24x256xf32>
    %133 = arith.mulf %132, %131 : vector<24x256xf32>
    %134 = arith.addf %127, %133 : vector<24x256xf32>
    %135 = vector.extract_strided_slice %75 {offsets = [2, 0, 0], sizes = [1, 24, 1], strides = [1, 1, 1]} : vector<5x24x1xf32> to vector<1x24x1xf32>
    %136 = vector.shape_cast %135 : vector<1x24x1xf32> to vector<24x1xf32>
    %c3_96 = arith.constant 3 : index
    %c0_97 = arith.constant 0 : index
    %c0_98 = arith.constant 0 : index
    %137 = vector.load %arg7[%c3_96, %c0_97, %c0_98] : memref<12x24x256xf32, #tpu.memory_space<vmem>>, vector<1x24x256xf32>
    %138 = vector.shape_cast %137 : vector<1x24x256xf32> to vector<24x256xf32>
    %139 = vector.broadcast %136 : vector<24x1xf32> to vector<24x256xf32>
    %140 = arith.mulf %139, %138 : vector<24x256xf32>
    %141 = arith.addf %134, %140 : vector<24x256xf32>
    %142 = vector.extract_strided_slice %75 {offsets = [3, 0, 0], sizes = [1, 24, 1], strides = [1, 1, 1]} : vector<5x24x1xf32> to vector<1x24x1xf32>
    %143 = vector.shape_cast %142 : vector<1x24x1xf32> to vector<24x1xf32>
    %c4_99 = arith.constant 4 : index
    %c0_100 = arith.constant 0 : index
    %c0_101 = arith.constant 0 : index
    %144 = vector.load %arg7[%c4_99, %c0_100, %c0_101] : memref<12x24x256xf32, #tpu.memory_space<vmem>>, vector<1x24x256xf32>
    %145 = vector.shape_cast %144 : vector<1x24x256xf32> to vector<24x256xf32>
    %146 = vector.broadcast %143 : vector<24x1xf32> to vector<24x256xf32>
    %147 = arith.mulf %146, %145 : vector<24x256xf32>
    %148 = arith.addf %141, %147 : vector<24x256xf32>
    %149 = vector.extract_strided_slice %75 {offsets = [4, 0, 0], sizes = [1, 24, 1], strides = [1, 1, 1]} : vector<5x24x1xf32> to vector<1x24x1xf32>
    %150 = vector.shape_cast %149 : vector<1x24x1xf32> to vector<24x1xf32>
    %c5_102 = arith.constant 5 : index
    %c0_103 = arith.constant 0 : index
    %c0_104 = arith.constant 0 : index
    %151 = vector.load %arg7[%c5_102, %c0_103, %c0_104] : memref<12x24x256xf32, #tpu.memory_space<vmem>>, vector<1x24x256xf32>
    %152 = vector.shape_cast %151 : vector<1x24x256xf32> to vector<24x256xf32>
    %153 = vector.broadcast %150 : vector<24x1xf32> to vector<24x256xf32>
    %154 = arith.mulf %153, %152 : vector<24x256xf32>
    %155 = arith.addf %148, %154 : vector<24x256xf32>
    %cst_105 = arith.constant 0.000000e+00 : f32
    %156 = vector.broadcast %cst_105 : f32 to vector<24x256xf32>
    %157 = arith.maximumf %155, %156 : vector<24x256xf32>
    %158 = arith.truncf %157 : vector<24x256xf32> to vector<24x256xbf16>
    %c0_106 = arith.constant 0 : index
    %c1_107 = arith.constant 1 : index
    %c0_108 = arith.constant 0 : index
    %c0_109 = arith.constant 0 : index
    %159 = vector.load %arg6[%c0_106, %c1_107, %c0_108, %c0_109] : memref<1x8x24x256xbf16, #tpu.memory_space<vmem>>, vector<1x1x24x256xbf16>
    %160 = vector.shape_cast %159 : vector<1x1x24x256xbf16> to vector<24x256xbf16>
    %161 = vector.shape_cast %158 : vector<24x256xbf16> to vector<1x1x24x256xbf16>
    tpu.vector_store %arg6[%c0_106, %c1_107, %c0_108, %c0_109], %161 {strides = array<i32>} : memref<1x8x24x256xbf16, #tpu.memory_space<vmem>>, vector<1x1x24x256xbf16>,
    %162 = vector.extract_strided_slice %75 {offsets = [0, 0, 0], sizes = [1, 24, 1], strides = [1, 1, 1]} : vector<5x24x1xf32> to vector<1x24x1xf32>
    %163 = vector.shape_cast %162 : vector<1x24x1xf32> to vector<24x1xf32>
    %c2_110 = arith.constant 2 : index
    %c0_111 = arith.constant 0 : index
    %c0_112 = arith.constant 0 : index
    %164 = vector.load %arg7[%c2_110, %c0_111, %c0_112] : memref<12x24x256xf32, #tpu.memory_space<vmem>>, vector<1x24x256xf32>
    %165 = vector.shape_cast %164 : vector<1x24x256xf32> to vector<24x256xf32>
    %166 = vector.broadcast %163 : vector<24x1xf32> to vector<24x256xf32>
    %167 = arith.mulf %166, %165 : vector<24x256xf32>
    %168 = arith.addf %79, %167 : vector<24x256xf32>
    %169 = vector.extract_strided_slice %75 {offsets = [1, 0, 0], sizes = [1, 24, 1], strides = [1, 1, 1]} : vector<5x24x1xf32> to vector<1x24x1xf32>
    %170 = vector.shape_cast %169 : vector<1x24x1xf32> to vector<24x1xf32>
    %c3_113 = arith.constant 3 : index
    %c0_114 = arith.constant 0 : index
    %c0_115 = arith.constant 0 : index
    %171 = vector.load %arg7[%c3_113, %c0_114, %c0_115] : memref<12x24x256xf32, #tpu.memory_space<vmem>>, vector<1x24x256xf32>
    %172 = vector.shape_cast %171 : vector<1x24x256xf32> to vector<24x256xf32>
    %173 = vector.broadcast %170 : vector<24x1xf32> to vector<24x256xf32>
    %174 = arith.mulf %173, %172 : vector<24x256xf32>
    %175 = arith.addf %168, %174 : vector<24x256xf32>
    %176 = vector.extract_strided_slice %75 {offsets = [2, 0, 0], sizes = [1, 24, 1], strides = [1, 1, 1]} : vector<5x24x1xf32> to vector<1x24x1xf32>
    %177 = vector.shape_cast %176 : vector<1x24x1xf32> to vector<24x1xf32>
    %c4_116 = arith.constant 4 : index
    %c0_117 = arith.constant 0 : index
    %c0_118 = arith.constant 0 : index
    %178 = vector.load %arg7[%c4_116, %c0_117, %c0_118] : memref<12x24x256xf32, #tpu.memory_space<vmem>>, vector<1x24x256xf32>
    %179 = vector.shape_cast %178 : vector<1x24x256xf32> to vector<24x256xf32>
    %180 = vector.broadcast %177 : vector<24x1xf32> to vector<24x256xf32>
    %181 = arith.mulf %180, %179 : vector<24x256xf32>
    %182 = arith.addf %175, %181 : vector<24x256xf32>
    %183 = vector.extract_strided_slice %75 {offsets = [3, 0, 0], sizes = [1, 24, 1], strides = [1, 1, 1]} : vector<5x24x1xf32> to vector<1x24x1xf32>
    %184 = vector.shape_cast %183 : vector<1x24x1xf32> to vector<24x1xf32>
    %c5_119 = arith.constant 5 : index
    %c0_120 = arith.constant 0 : index
    %c0_121 = arith.constant 0 : index
    %185 = vector.load %arg7[%c5_119, %c0_120, %c0_121] : memref<12x24x256xf32, #tpu.memory_space<vmem>>, vector<1x24x256xf32>
    %186 = vector.shape_cast %185 : vector<1x24x256xf32> to vector<24x256xf32>
    %187 = vector.broadcast %184 : vector<24x1xf32> to vector<24x256xf32>
    %188 = arith.mulf %187, %186 : vector<24x256xf32>
    %189 = arith.addf %182, %188 : vector<24x256xf32>
    %190 = vector.extract_strided_slice %75 {offsets = [4, 0, 0], sizes = [1, 24, 1], strides = [1, 1, 1]} : vector<5x24x1xf32> to vector<1x24x1xf32>
    %191 = vector.shape_cast %190 : vector<1x24x1xf32> to vector<24x1xf32>
    %c6_122 = arith.constant 6 : index
    %c0_123 = arith.constant 0 : index
    %c0_124 = arith.constant 0 : index
    %192 = vector.load %arg7[%c6_122, %c0_123, %c0_124] : memref<12x24x256xf32, #tpu.memory_space<vmem>>, vector<1x24x256xf32>
    %193 = vector.shape_cast %192 : vector<1x24x256xf32> to vector<24x256xf32>
    %194 = vector.broadcast %191 : vector<24x1xf32> to vector<24x256xf32>
    %195 = arith.mulf %194, %193 : vector<24x256xf32>
    %196 = arith.addf %189, %195 : vector<24x256xf32>
    %cst_125 = arith.constant 0.000000e+00 : f32
    %197 = vector.broadcast %cst_125 : f32 to vector<24x256xf32>
    %198 = arith.maximumf %196, %197 : vector<24x256xf32>
    %199 = arith.truncf %198 : vector<24x256xf32> to vector<24x256xbf16>
    %c0_126 = arith.constant 0 : index
    %c2_127 = arith.constant 2 : index
    %c0_128 = arith.constant 0 : index
    %c0_129 = arith.constant 0 : index
    %200 = vector.load %arg6[%c0_126, %c2_127, %c0_128, %c0_129] : memref<1x8x24x256xbf16, #tpu.memory_space<vmem>>, vector<1x1x24x256xbf16>
    %201 = vector.shape_cast %200 : vector<1x1x24x256xbf16> to vector<24x256xbf16>
    %202 = vector.shape_cast %199 : vector<24x256xbf16> to vector<1x1x24x256xbf16>
    tpu.vector_store %arg6[%c0_126, %c2_127, %c0_128, %c0_129], %202 {strides = array<i32>} : memref<1x8x24x256xbf16, #tpu.memory_space<vmem>>, vector<1x1x24x256xbf16>,
    %203 = vector.extract_strided_slice %75 {offsets = [0, 0, 0], sizes = [1, 24, 1], strides = [1, 1, 1]} : vector<5x24x1xf32> to vector<1x24x1xf32>
    %204 = vector.shape_cast %203 : vector<1x24x1xf32> to vector<24x1xf32>
    %c3_130 = arith.constant 3 : index
    %c0_131 = arith.constant 0 : index
    %c0_132 = arith.constant 0 : index
    %205 = vector.load %arg7[%c3_130, %c0_131, %c0_132] : memref<12x24x256xf32, #tpu.memory_space<vmem>>, vector<1x24x256xf32>
    %206 = vector.shape_cast %205 : vector<1x24x256xf32> to vector<24x256xf32>
    %207 = vector.broadcast %204 : vector<24x1xf32> to vector<24x256xf32>
    %208 = arith.mulf %207, %206 : vector<24x256xf32>
    %209 = arith.addf %79, %208 : vector<24x256xf32>
    %210 = vector.extract_strided_slice %75 {offsets = [1, 0, 0], sizes = [1, 24, 1], strides = [1, 1, 1]} : vector<5x24x1xf32> to vector<1x24x1xf32>
    %211 = vector.shape_cast %210 : vector<1x24x1xf32> to vector<24x1xf32>
    %c4_133 = arith.constant 4 : index
    %c0_134 = arith.constant 0 : index
    %c0_135 = arith.constant 0 : index
    %212 = vector.load %arg7[%c4_133, %c0_134, %c0_135] : memref<12x24x256xf32, #tpu.memory_space<vmem>>, vector<1x24x256xf32>
    %213 = vector.shape_cast %212 : vector<1x24x256xf32> to vector<24x256xf32>
    %214 = vector.broadcast %211 : vector<24x1xf32> to vector<24x256xf32>
    %215 = arith.mulf %214, %213 : vector<24x256xf32>
    %216 = arith.addf %209, %215 : vector<24x256xf32>
    %217 = vector.extract_strided_slice %75 {offsets = [2, 0, 0], sizes = [1, 24, 1], strides = [1, 1, 1]} : vector<5x24x1xf32> to vector<1x24x1xf32>
    %218 = vector.shape_cast %217 : vector<1x24x1xf32> to vector<24x1xf32>
    %c5_136 = arith.constant 5 : index
    %c0_137 = arith.constant 0 : index
    %c0_138 = arith.constant 0 : index
    %219 = vector.load %arg7[%c5_136, %c0_137, %c0_138] : memref<12x24x256xf32, #tpu.memory_space<vmem>>, vector<1x24x256xf32>
    %220 = vector.shape_cast %219 : vector<1x24x256xf32> to vector<24x256xf32>
    %221 = vector.broadcast %218 : vector<24x1xf32> to vector<24x256xf32>
    %222 = arith.mulf %221, %220 : vector<24x256xf32>
    %223 = arith.addf %216, %222 : vector<24x256xf32>
    %224 = vector.extract_strided_slice %75 {offsets = [3, 0, 0], sizes = [1, 24, 1], strides = [1, 1, 1]} : vector<5x24x1xf32> to vector<1x24x1xf32>
    %225 = vector.shape_cast %224 : vector<1x24x1xf32> to vector<24x1xf32>
    %c6_139 = arith.constant 6 : index
    %c0_140 = arith.constant 0 : index
    %c0_141 = arith.constant 0 : index
    %226 = vector.load %arg7[%c6_139, %c0_140, %c0_141] : memref<12x24x256xf32, #tpu.memory_space<vmem>>, vector<1x24x256xf32>
    %227 = vector.shape_cast %226 : vector<1x24x256xf32> to vector<24x256xf32>
    %228 = vector.broadcast %225 : vector<24x1xf32> to vector<24x256xf32>
    %229 = arith.mulf %228, %227 : vector<24x256xf32>
    %230 = arith.addf %223, %229 : vector<24x256xf32>
    %231 = vector.extract_strided_slice %75 {offsets = [4, 0, 0], sizes = [1, 24, 1], strides = [1, 1, 1]} : vector<5x24x1xf32> to vector<1x24x1xf32>
    %232 = vector.shape_cast %231 : vector<1x24x1xf32> to vector<24x1xf32>
    %c7_142 = arith.constant 7 : index
    %c0_143 = arith.constant 0 : index
    %c0_144 = arith.constant 0 : index
    %233 = vector.load %arg7[%c7_142, %c0_143, %c0_144] : memref<12x24x256xf32, #tpu.memory_space<vmem>>, vector<1x24x256xf32>
    %234 = vector.shape_cast %233 : vector<1x24x256xf32> to vector<24x256xf32>
    %235 = vector.broadcast %232 : vector<24x1xf32> to vector<24x256xf32>
    %236 = arith.mulf %235, %234 : vector<24x256xf32>
    %237 = arith.addf %230, %236 : vector<24x256xf32>
    %cst_145 = arith.constant 0.000000e+00 : f32
    %238 = vector.broadcast %cst_145 : f32 to vector<24x256xf32>
    %239 = arith.maximumf %237, %238 : vector<24x256xf32>
    %240 = arith.truncf %239 : vector<24x256xf32> to vector<24x256xbf16>
    %c0_146 = arith.constant 0 : index
    %c3_147 = arith.constant 3 : index
    %c0_148 = arith.constant 0 : index
    %c0_149 = arith.constant 0 : index
    %241 = vector.load %arg6[%c0_146, %c3_147, %c0_148, %c0_149] : memref<1x8x24x256xbf16, #tpu.memory_space<vmem>>, vector<1x1x24x256xbf16>
    %242 = vector.shape_cast %241 : vector<1x1x24x256xbf16> to vector<24x256xbf16>
    %243 = vector.shape_cast %240 : vector<24x256xbf16> to vector<1x1x24x256xbf16>
    tpu.vector_store %arg6[%c0_146, %c3_147, %c0_148, %c0_149], %243 {strides = array<i32>} : memref<1x8x24x256xbf16, #tpu.memory_space<vmem>>, vector<1x1x24x256xbf16>,
    %244 = vector.extract_strided_slice %75 {offsets = [0, 0, 0], sizes = [1, 24, 1], strides = [1, 1, 1]} : vector<5x24x1xf32> to vector<1x24x1xf32>
    %245 = vector.shape_cast %244 : vector<1x24x1xf32> to vector<24x1xf32>
    %c4_150 = arith.constant 4 : index
    %c0_151 = arith.constant 0 : index
    %c0_152 = arith.constant 0 : index
    %246 = vector.load %arg7[%c4_150, %c0_151, %c0_152] : memref<12x24x256xf32, #tpu.memory_space<vmem>>, vector<1x24x256xf32>
    %247 = vector.shape_cast %246 : vector<1x24x256xf32> to vector<24x256xf32>
    %248 = vector.broadcast %245 : vector<24x1xf32> to vector<24x256xf32>
    %249 = arith.mulf %248, %247 : vector<24x256xf32>
    %250 = arith.addf %79, %249 : vector<24x256xf32>
    %251 = vector.extract_strided_slice %75 {offsets = [1, 0, 0], sizes = [1, 24, 1], strides = [1, 1, 1]} : vector<5x24x1xf32> to vector<1x24x1xf32>
    %252 = vector.shape_cast %251 : vector<1x24x1xf32> to vector<24x1xf32>
    %c5_153 = arith.constant 5 : index
    %c0_154 = arith.constant 0 : index
    %c0_155 = arith.constant 0 : index
    %253 = vector.load %arg7[%c5_153, %c0_154, %c0_155] : memref<12x24x256xf32, #tpu.memory_space<vmem>>, vector<1x24x256xf32>
    %254 = vector.shape_cast %253 : vector<1x24x256xf32> to vector<24x256xf32>
    %255 = vector.broadcast %252 : vector<24x1xf32> to vector<24x256xf32>
    %256 = arith.mulf %255, %254 : vector<24x256xf32>
    %257 = arith.addf %250, %256 : vector<24x256xf32>
    %258 = vector.extract_strided_slice %75 {offsets = [2, 0, 0], sizes = [1, 24, 1], strides = [1, 1, 1]} : vector<5x24x1xf32> to vector<1x24x1xf32>
    %259 = vector.shape_cast %258 : vector<1x24x1xf32> to vector<24x1xf32>
    %c6_156 = arith.constant 6 : index
    %c0_157 = arith.constant 0 : index
    %c0_158 = arith.constant 0 : index
    %260 = vector.load %arg7[%c6_156, %c0_157, %c0_158] : memref<12x24x256xf32, #tpu.memory_space<vmem>>, vector<1x24x256xf32>
    %261 = vector.shape_cast %260 : vector<1x24x256xf32> to vector<24x256xf32>
    %262 = vector.broadcast %259 : vector<24x1xf32> to vector<24x256xf32>
    %263 = arith.mulf %262, %261 : vector<24x256xf32>
    %264 = arith.addf %257, %263 : vector<24x256xf32>
    %265 = vector.extract_strided_slice %75 {offsets = [3, 0, 0], sizes = [1, 24, 1], strides = [1, 1, 1]} : vector<5x24x1xf32> to vector<1x24x1xf32>
    %266 = vector.shape_cast %265 : vector<1x24x1xf32> to vector<24x1xf32>
    %c7_159 = arith.constant 7 : index
    %c0_160 = arith.constant 0 : index
    %c0_161 = arith.constant 0 : index
    %267 = vector.load %arg7[%c7_159, %c0_160, %c0_161] : memref<12x24x256xf32, #tpu.memory_space<vmem>>, vector<1x24x256xf32>
    %268 = vector.shape_cast %267 : vector<1x24x256xf32> to vector<24x256xf32>
    %269 = vector.broadcast %266 : vector<24x1xf32> to vector<24x256xf32>
    %270 = arith.mulf %269, %268 : vector<24x256xf32>
    %271 = arith.addf %264, %270 : vector<24x256xf32>
    %272 = vector.extract_strided_slice %75 {offsets = [4, 0, 0], sizes = [1, 24, 1], strides = [1, 1, 1]} : vector<5x24x1xf32> to vector<1x24x1xf32>
    %273 = vector.shape_cast %272 : vector<1x24x1xf32> to vector<24x1xf32>
    %c8_162 = arith.constant 8 : index
    %c0_163 = arith.constant 0 : index
    %c0_164 = arith.constant 0 : index
    %274 = vector.load %arg7[%c8_162, %c0_163, %c0_164] : memref<12x24x256xf32, #tpu.memory_space<vmem>>, vector<1x24x256xf32>
    %275 = vector.shape_cast %274 : vector<1x24x256xf32> to vector<24x256xf32>
    %276 = vector.broadcast %273 : vector<24x1xf32> to vector<24x256xf32>
    %277 = arith.mulf %276, %275 : vector<24x256xf32>
    %278 = arith.addf %271, %277 : vector<24x256xf32>
    %cst_165 = arith.constant 0.000000e+00 : f32
    %279 = vector.broadcast %cst_165 : f32 to vector<24x256xf32>
    %280 = arith.maximumf %278, %279 : vector<24x256xf32>
    %281 = arith.truncf %280 : vector<24x256xf32> to vector<24x256xbf16>
    %c0_166 = arith.constant 0 : index
    %c4_167 = arith.constant 4 : index
    %c0_168 = arith.constant 0 : index
    %c0_169 = arith.constant 0 : index
    %282 = vector.load %arg6[%c0_166, %c4_167, %c0_168, %c0_169] : memref<1x8x24x256xbf16, #tpu.memory_space<vmem>>, vector<1x1x24x256xbf16>
    %283 = vector.shape_cast %282 : vector<1x1x24x256xbf16> to vector<24x256xbf16>
    %284 = vector.shape_cast %281 : vector<24x256xbf16> to vector<1x1x24x256xbf16>
    tpu.vector_store %arg6[%c0_166, %c4_167, %c0_168, %c0_169], %284 {strides = array<i32>} : memref<1x8x24x256xbf16, #tpu.memory_space<vmem>>, vector<1x1x24x256xbf16>,
    %285 = vector.extract_strided_slice %75 {offsets = [0, 0, 0], sizes = [1, 24, 1], strides = [1, 1, 1]} : vector<5x24x1xf32> to vector<1x24x1xf32>
    %286 = vector.shape_cast %285 : vector<1x24x1xf32> to vector<24x1xf32>
    %c5_170 = arith.constant 5 : index
    %c0_171 = arith.constant 0 : index
    %c0_172 = arith.constant 0 : index
    %287 = vector.load %arg7[%c5_170, %c0_171, %c0_172] : memref<12x24x256xf32, #tpu.memory_space<vmem>>, vector<1x24x256xf32>
    %288 = vector.shape_cast %287 : vector<1x24x256xf32> to vector<24x256xf32>
    %289 = vector.broadcast %286 : vector<24x1xf32> to vector<24x256xf32>
    %290 = arith.mulf %289, %288 : vector<24x256xf32>
    %291 = arith.addf %79, %290 : vector<24x256xf32>
    %292 = vector.extract_strided_slice %75 {offsets = [1, 0, 0], sizes = [1, 24, 1], strides = [1, 1, 1]} : vector<5x24x1xf32> to vector<1x24x1xf32>
    %293 = vector.shape_cast %292 : vector<1x24x1xf32> to vector<24x1xf32>
    %c6_173 = arith.constant 6 : index
    %c0_174 = arith.constant 0 : index
    %c0_175 = arith.constant 0 : index
    %294 = vector.load %arg7[%c6_173, %c0_174, %c0_175] : memref<12x24x256xf32, #tpu.memory_space<vmem>>, vector<1x24x256xf32>
    %295 = vector.shape_cast %294 : vector<1x24x256xf32> to vector<24x256xf32>
    %296 = vector.broadcast %293 : vector<24x1xf32> to vector<24x256xf32>
    %297 = arith.mulf %296, %295 : vector<24x256xf32>
    %298 = arith.addf %291, %297 : vector<24x256xf32>
    %299 = vector.extract_strided_slice %75 {offsets = [2, 0, 0], sizes = [1, 24, 1], strides = [1, 1, 1]} : vector<5x24x1xf32> to vector<1x24x1xf32>
    %300 = vector.shape_cast %299 : vector<1x24x1xf32> to vector<24x1xf32>
    %c7_176 = arith.constant 7 : index
    %c0_177 = arith.constant 0 : index
    %c0_178 = arith.constant 0 : index
    %301 = vector.load %arg7[%c7_176, %c0_177, %c0_178] : memref<12x24x256xf32, #tpu.memory_space<vmem>>, vector<1x24x256xf32>
    %302 = vector.shape_cast %301 : vector<1x24x256xf32> to vector<24x256xf32>
    %303 = vector.broadcast %300 : vector<24x1xf32> to vector<24x256xf32>
    %304 = arith.mulf %303, %302 : vector<24x256xf32>
    %305 = arith.addf %298, %304 : vector<24x256xf32>
    %306 = vector.extract_strided_slice %75 {offsets = [3, 0, 0], sizes = [1, 24, 1], strides = [1, 1, 1]} : vector<5x24x1xf32> to vector<1x24x1xf32>
    %307 = vector.shape_cast %306 : vector<1x24x1xf32> to vector<24x1xf32>
    %c8_179 = arith.constant 8 : index
    %c0_180 = arith.constant 0 : index
    %c0_181 = arith.constant 0 : index
    %308 = vector.load %arg7[%c8_179, %c0_180, %c0_181] : memref<12x24x256xf32, #tpu.memory_space<vmem>>, vector<1x24x256xf32>
    %309 = vector.shape_cast %308 : vector<1x24x256xf32> to vector<24x256xf32>
    %310 = vector.broadcast %307 : vector<24x1xf32> to vector<24x256xf32>
    %311 = arith.mulf %310, %309 : vector<24x256xf32>
    %312 = arith.addf %305, %311 : vector<24x256xf32>
    %313 = vector.extract_strided_slice %75 {offsets = [4, 0, 0], sizes = [1, 24, 1], strides = [1, 1, 1]} : vector<5x24x1xf32> to vector<1x24x1xf32>
    %314 = vector.shape_cast %313 : vector<1x24x1xf32> to vector<24x1xf32>
    %c9_182 = arith.constant 9 : index
    %c0_183 = arith.constant 0 : index
    %c0_184 = arith.constant 0 : index
    %315 = vector.load %arg7[%c9_182, %c0_183, %c0_184] : memref<12x24x256xf32, #tpu.memory_space<vmem>>, vector<1x24x256xf32>
    %316 = vector.shape_cast %315 : vector<1x24x256xf32> to vector<24x256xf32>
    %317 = vector.broadcast %314 : vector<24x1xf32> to vector<24x256xf32>
    %318 = arith.mulf %317, %316 : vector<24x256xf32>
    %319 = arith.addf %312, %318 : vector<24x256xf32>
    %cst_185 = arith.constant 0.000000e+00 : f32
    %320 = vector.broadcast %cst_185 : f32 to vector<24x256xf32>
    %321 = arith.maximumf %319, %320 : vector<24x256xf32>
    %322 = arith.truncf %321 : vector<24x256xf32> to vector<24x256xbf16>
    %c0_186 = arith.constant 0 : index
    %c5_187 = arith.constant 5 : index
    %c0_188 = arith.constant 0 : index
    %c0_189 = arith.constant 0 : index
    %323 = vector.load %arg6[%c0_186, %c5_187, %c0_188, %c0_189] : memref<1x8x24x256xbf16, #tpu.memory_space<vmem>>, vector<1x1x24x256xbf16>
    %324 = vector.shape_cast %323 : vector<1x1x24x256xbf16> to vector<24x256xbf16>
    %325 = vector.shape_cast %322 : vector<24x256xbf16> to vector<1x1x24x256xbf16>
    tpu.vector_store %arg6[%c0_186, %c5_187, %c0_188, %c0_189], %325 {strides = array<i32>} : memref<1x8x24x256xbf16, #tpu.memory_space<vmem>>, vector<1x1x24x256xbf16>,
    %326 = vector.extract_strided_slice %75 {offsets = [0, 0, 0], sizes = [1, 24, 1], strides = [1, 1, 1]} : vector<5x24x1xf32> to vector<1x24x1xf32>
    %327 = vector.shape_cast %326 : vector<1x24x1xf32> to vector<24x1xf32>
    %c6_190 = arith.constant 6 : index
    %c0_191 = arith.constant 0 : index
    %c0_192 = arith.constant 0 : index
    %328 = vector.load %arg7[%c6_190, %c0_191, %c0_192] : memref<12x24x256xf32, #tpu.memory_space<vmem>>, vector<1x24x256xf32>
    %329 = vector.shape_cast %328 : vector<1x24x256xf32> to vector<24x256xf32>
    %330 = vector.broadcast %327 : vector<24x1xf32> to vector<24x256xf32>
    %331 = arith.mulf %330, %329 : vector<24x256xf32>
    %332 = arith.addf %79, %331 : vector<24x256xf32>
    %333 = vector.extract_strided_slice %75 {offsets = [1, 0, 0], sizes = [1, 24, 1], strides = [1, 1, 1]} : vector<5x24x1xf32> to vector<1x24x1xf32>
    %334 = vector.shape_cast %333 : vector<1x24x1xf32> to vector<24x1xf32>
    %c7_193 = arith.constant 7 : index
    %c0_194 = arith.constant 0 : index
    %c0_195 = arith.constant 0 : index
    %335 = vector.load %arg7[%c7_193, %c0_194, %c0_195] : memref<12x24x256xf32, #tpu.memory_space<vmem>>, vector<1x24x256xf32>
    %336 = vector.shape_cast %335 : vector<1x24x256xf32> to vector<24x256xf32>
    %337 = vector.broadcast %334 : vector<24x1xf32> to vector<24x256xf32>
    %338 = arith.mulf %337, %336 : vector<24x256xf32>
    %339 = arith.addf %332, %338 : vector<24x256xf32>
    %340 = vector.extract_strided_slice %75 {offsets = [2, 0, 0], sizes = [1, 24, 1], strides = [1, 1, 1]} : vector<5x24x1xf32> to vector<1x24x1xf32>
    %341 = vector.shape_cast %340 : vector<1x24x1xf32> to vector<24x1xf32>
    %c8_196 = arith.constant 8 : index
    %c0_197 = arith.constant 0 : index
    %c0_198 = arith.constant 0 : index
    %342 = vector.load %arg7[%c8_196, %c0_197, %c0_198] : memref<12x24x256xf32, #tpu.memory_space<vmem>>, vector<1x24x256xf32>
    %343 = vector.shape_cast %342 : vector<1x24x256xf32> to vector<24x256xf32>
    %344 = vector.broadcast %341 : vector<24x1xf32> to vector<24x256xf32>
    %345 = arith.mulf %344, %343 : vector<24x256xf32>
    %346 = arith.addf %339, %345 : vector<24x256xf32>
    %347 = vector.extract_strided_slice %75 {offsets = [3, 0, 0], sizes = [1, 24, 1], strides = [1, 1, 1]} : vector<5x24x1xf32> to vector<1x24x1xf32>
    %348 = vector.shape_cast %347 : vector<1x24x1xf32> to vector<24x1xf32>
    %c9_199 = arith.constant 9 : index
    %c0_200 = arith.constant 0 : index
    %c0_201 = arith.constant 0 : index
    %349 = vector.load %arg7[%c9_199, %c0_200, %c0_201] : memref<12x24x256xf32, #tpu.memory_space<vmem>>, vector<1x24x256xf32>
    %350 = vector.shape_cast %349 : vector<1x24x256xf32> to vector<24x256xf32>
    %351 = vector.broadcast %348 : vector<24x1xf32> to vector<24x256xf32>
    %352 = arith.mulf %351, %350 : vector<24x256xf32>
    %353 = arith.addf %346, %352 : vector<24x256xf32>
    %354 = vector.extract_strided_slice %75 {offsets = [4, 0, 0], sizes = [1, 24, 1], strides = [1, 1, 1]} : vector<5x24x1xf32> to vector<1x24x1xf32>
    %355 = vector.shape_cast %354 : vector<1x24x1xf32> to vector<24x1xf32>
    %c10_202 = arith.constant 10 : index
    %c0_203 = arith.constant 0 : index
    %c0_204 = arith.constant 0 : index
    %356 = vector.load %arg7[%c10_202, %c0_203, %c0_204] : memref<12x24x256xf32, #tpu.memory_space<vmem>>, vector<1x24x256xf32>
    %357 = vector.shape_cast %356 : vector<1x24x256xf32> to vector<24x256xf32>
    %358 = vector.broadcast %355 : vector<24x1xf32> to vector<24x256xf32>
    %359 = arith.mulf %358, %357 : vector<24x256xf32>
    %360 = arith.addf %353, %359 : vector<24x256xf32>
    %cst_205 = arith.constant 0.000000e+00 : f32
    %361 = vector.broadcast %cst_205 : f32 to vector<24x256xf32>
    %362 = arith.maximumf %360, %361 : vector<24x256xf32>
    %363 = arith.truncf %362 : vector<24x256xf32> to vector<24x256xbf16>
    %c0_206 = arith.constant 0 : index
    %c6_207 = arith.constant 6 : index
    %c0_208 = arith.constant 0 : index
    %c0_209 = arith.constant 0 : index
    %364 = vector.load %arg6[%c0_206, %c6_207, %c0_208, %c0_209] : memref<1x8x24x256xbf16, #tpu.memory_space<vmem>>, vector<1x1x24x256xbf16>
    %365 = vector.shape_cast %364 : vector<1x1x24x256xbf16> to vector<24x256xbf16>
    %366 = vector.shape_cast %363 : vector<24x256xbf16> to vector<1x1x24x256xbf16>
    tpu.vector_store %arg6[%c0_206, %c6_207, %c0_208, %c0_209], %366 {strides = array<i32>} : memref<1x8x24x256xbf16, #tpu.memory_space<vmem>>, vector<1x1x24x256xbf16>,
    %367 = vector.extract_strided_slice %75 {offsets = [0, 0, 0], sizes = [1, 24, 1], strides = [1, 1, 1]} : vector<5x24x1xf32> to vector<1x24x1xf32>
    %368 = vector.shape_cast %367 : vector<1x24x1xf32> to vector<24x1xf32>
    %c7_210 = arith.constant 7 : index
    %c0_211 = arith.constant 0 : index
    %c0_212 = arith.constant 0 : index
    %369 = vector.load %arg7[%c7_210, %c0_211, %c0_212] : memref<12x24x256xf32, #tpu.memory_space<vmem>>, vector<1x24x256xf32>
    %370 = vector.shape_cast %369 : vector<1x24x256xf32> to vector<24x256xf32>
    %371 = vector.broadcast %368 : vector<24x1xf32> to vector<24x256xf32>
    %372 = arith.mulf %371, %370 : vector<24x256xf32>
    %373 = arith.addf %79, %372 : vector<24x256xf32>
    %374 = vector.extract_strided_slice %75 {offsets = [1, 0, 0], sizes = [1, 24, 1], strides = [1, 1, 1]} : vector<5x24x1xf32> to vector<1x24x1xf32>
    %375 = vector.shape_cast %374 : vector<1x24x1xf32> to vector<24x1xf32>
    %c8_213 = arith.constant 8 : index
    %c0_214 = arith.constant 0 : index
    %c0_215 = arith.constant 0 : index
    %376 = vector.load %arg7[%c8_213, %c0_214, %c0_215] : memref<12x24x256xf32, #tpu.memory_space<vmem>>, vector<1x24x256xf32>
    %377 = vector.shape_cast %376 : vector<1x24x256xf32> to vector<24x256xf32>
    %378 = vector.broadcast %375 : vector<24x1xf32> to vector<24x256xf32>
    %379 = arith.mulf %378, %377 : vector<24x256xf32>
    %380 = arith.addf %373, %379 : vector<24x256xf32>
    %381 = vector.extract_strided_slice %75 {offsets = [2, 0, 0], sizes = [1, 24, 1], strides = [1, 1, 1]} : vector<5x24x1xf32> to vector<1x24x1xf32>
    %382 = vector.shape_cast %381 : vector<1x24x1xf32> to vector<24x1xf32>
    %c9_216 = arith.constant 9 : index
    %c0_217 = arith.constant 0 : index
    %c0_218 = arith.constant 0 : index
    %383 = vector.load %arg7[%c9_216, %c0_217, %c0_218] : memref<12x24x256xf32, #tpu.memory_space<vmem>>, vector<1x24x256xf32>
    %384 = vector.shape_cast %383 : vector<1x24x256xf32> to vector<24x256xf32>
    %385 = vector.broadcast %382 : vector<24x1xf32> to vector<24x256xf32>
    %386 = arith.mulf %385, %384 : vector<24x256xf32>
    %387 = arith.addf %380, %386 : vector<24x256xf32>
    %388 = vector.extract_strided_slice %75 {offsets = [3, 0, 0], sizes = [1, 24, 1], strides = [1, 1, 1]} : vector<5x24x1xf32> to vector<1x24x1xf32>
    %389 = vector.shape_cast %388 : vector<1x24x1xf32> to vector<24x1xf32>
    %c10_219 = arith.constant 10 : index
    %c0_220 = arith.constant 0 : index
    %c0_221 = arith.constant 0 : index
    %390 = vector.load %arg7[%c10_219, %c0_220, %c0_221] : memref<12x24x256xf32, #tpu.memory_space<vmem>>, vector<1x24x256xf32>
    %391 = vector.shape_cast %390 : vector<1x24x256xf32> to vector<24x256xf32>
    %392 = vector.broadcast %389 : vector<24x1xf32> to vector<24x256xf32>
    %393 = arith.mulf %392, %391 : vector<24x256xf32>
    %394 = arith.addf %387, %393 : vector<24x256xf32>
    %395 = vector.extract_strided_slice %75 {offsets = [4, 0, 0], sizes = [1, 24, 1], strides = [1, 1, 1]} : vector<5x24x1xf32> to vector<1x24x1xf32>
    %396 = vector.shape_cast %395 : vector<1x24x1xf32> to vector<24x1xf32>
    %c11_222 = arith.constant 11 : index
    %c0_223 = arith.constant 0 : index
    %c0_224 = arith.constant 0 : index
    %397 = vector.load %arg7[%c11_222, %c0_223, %c0_224] : memref<12x24x256xf32, #tpu.memory_space<vmem>>, vector<1x24x256xf32>
    %398 = vector.shape_cast %397 : vector<1x24x256xf32> to vector<24x256xf32>
    %399 = vector.broadcast %396 : vector<24x1xf32> to vector<24x256xf32>
    %400 = arith.mulf %399, %398 : vector<24x256xf32>
    %401 = arith.addf %394, %400 : vector<24x256xf32>
    %cst_225 = arith.constant 0.000000e+00 : f32
    %402 = vector.broadcast %cst_225 : f32 to vector<24x256xf32>
    %403 = arith.maximumf %401, %402 : vector<24x256xf32>
    %404 = arith.truncf %403 : vector<24x256xf32> to vector<24x256xbf16>
    %c0_226 = arith.constant 0 : index
    %c7_227 = arith.constant 7 : index
    %c0_228 = arith.constant 0 : index
    %c0_229 = arith.constant 0 : index
    %405 = vector.load %arg6[%c0_226, %c7_227, %c0_228, %c0_229] : memref<1x8x24x256xbf16, #tpu.memory_space<vmem>>, vector<1x1x24x256xbf16>
    %406 = vector.shape_cast %405 : vector<1x1x24x256xbf16> to vector<24x256xbf16>
    %407 = vector.shape_cast %404 : vector<24x256xbf16> to vector<1x1x24x256xbf16>
    tpu.vector_store %arg6[%c0_226, %c7_227, %c0_228, %c0_229], %407 {strides = array<i32>} : memref<1x8x24x256xbf16, #tpu.memory_space<vmem>>, vector<1x1x24x256xbf16>,
    return
  }
  func.func @transform_0(%arg0: i32, %arg1: i32) -> (i32, i32, i32) {
    %c0_i32 = arith.constant 0 : i32
    %c0_i32_0 = arith.constant 0 : i32
    return %arg0, %c0_i32, %arg1 : i32, i32, i32
  }
  func.func @transform_1(%arg0: i32, %arg1: i32) -> (i32, i32, i32) {
    %c0_i32 = arith.constant 0 : i32
    %c0_i32_0 = arith.constant 0 : i32
    %c0_i32_1 = arith.constant 0 : i32
    return %arg0, %c0_i32, %c0_i32_0 : i32, i32, i32
  }
  func.func @transform_2(%arg0: i32, %arg1: i32) -> (i32, i32, i32, i32) {
    %c0_i32 = arith.constant 0 : i32
    %c0_i32_0 = arith.constant 0 : i32
    %c0_i32_1 = arith.constant 0 : i32
    %c0_i32_2 = arith.constant 0 : i32
    return %arg0, %c0_i32, %c0_i32_0, %c0_i32_1 : i32, i32, i32, i32
  }
  func.func @transform_3(%arg0: i32, %arg1: i32) -> (i32, i32, i32) {
    %c0_i32 = arith.constant 0 : i32
    %c0_i32_0 = arith.constant 0 : i32
    %c0_i32_1 = arith.constant 0 : i32
    return %arg0, %c0_i32, %c0_i32_0 : i32, i32, i32
  }
  func.func @transform_4(%arg0: i32, %arg1: i32) -> (i32, i32, i32, i32) {
    %c0_i32 = arith.constant 0 : i32
    %c0_i32_0 = arith.constant 0 : i32
    %c0_i32_1 = arith.constant 0 : i32
    return %arg0, %c0_i32, %c0_i32_0, %arg1 : i32, i32, i32, i32
  }
}

</mosaic_0001>

<bundles_post_ra>
// kernel: tpu_custom_call.1
= control target key start
LH: loop header
LB: loop body
LE: loop exit
PB: predicated region body
PF: predicated region fallthrough
CT: control target
= control target key end

     0   :  { %9 = vsyncpa [#allocation4], 0  ;;  %s3967_s0 = inlined_call_operand.hbm [shape: bf16[2,384,512], index: 0, kind: input, shape index: {}]   ;;  %s3968_s1 = inlined_call_operand.vmem [shape: bf16[2,24,32], index: 1, kind: input, shape index: {}]   ;;  %s3969_s2 = inlined_call_operand.vmem [shape: f32[2,5,24,1], index: 2, kind: input, shape index: {}]   ;;  %s3970_s3 = inlined_call_operand.vmem [shape: f32[2,24,1], index: 3, kind: input, shape index: {}]   ;;  %s3971_s4 = inlined_call_operand.hbm [shape: bf16[2,8,24,512], index: 4, kind: output, shape index: {}]  }
   0x1   :  { %11 = vsyncpa [#allocation4 + $0x1], 0 }
   0x2   :  { %12 = vsyncpa [#allocation5], 0 }
   0x3   :  { %14 = vsyncpa [#allocation5 + $0x1], 0  ;;  %s2781_s15 = smov 0   ;;  %s2783_s16 = smov 0  }
   0x4   :  { %s2785_s17 = smov 0   ;;  %s2787_s18 = smov 0  }
   0x5   :  { %s2789_s19 = smov 0   ;;  %s2791_s20 = smov 0  }
   0x6   :  { %s2793_s21 = smov 0   ;;  %s2795_s22 = smov 0  }
   0x7 LB: > { %3982 = sst [smem:[#allocation9_spill]] %s2739_s20  ;;  %s2195_s23 = sadd.s32 4294967295, %s2747_s22   ;;  %s2747_s22 = sphi %s2795_s22, %s20_s22   ;;  %s2743_s21 = sphi %s2793_s21, %s4014_s21   ;;  %s2739_s20 = sphi %s2791_s20, %s4013_s20   ;;  %s2735_s19 = sphi %s2789_s19, %s4012_s19   ;;  %s2731_s18 = sphi %s2787_s18, %s4018_s18   ;;  %s2727_s17 = sphi %s2785_s17, %s4017_s17   ;;  %s2723_s16 = sphi %s2783_s16, %s4016_s16   ;;  %s2719_s15 = sphi %s2781_s15, %s4015_s15  }
   0x8   : > { %3983 = sst [smem:[#allocation10_spill]] %s2743_s21  ;;  %s2196_s24 = sadd.s32 4294967294, %s2747_s22  }
   0x9   : > { %s29_s25 = sadd.s32 1, %s2739_s20  ;;  %s32_s26 = sadd.s32 1, %s2743_s21 }
   0xa   : > { %p30_p0 = scmp.ge.s32.totalorder %s29_s25, 2  ;;  %s41_s27 = sadd.s32 1, %s2727_s17 }
   0xb   : > { %p48_p1 = scmp.ne.s32.totalorder %s2727_s17, %s2723_s16  ;;  %p49_p2 = scmp.eq.s32.totalorder %s2747_s22, 0 }
   0xc   : > { %s4020_s25 = smov (%p30_p0, %s29_s25), 0  ;;  %s4022_s26 = smov (!%p30_p0, %s32_s26), %s2743_s21 }
   0xd   : > { %3984 = sst [smem:[#allocation11_spill]] %s4020_s25  ;;  %s37_s28 = ssub.s32 %s2739_s20, %s4020_s25 }
   0xe   : > { %p2834_p3 = por %p49_p2, %p48_p1  ;;  %p34_p4 = scmp.ge.s32.totalorder %s4022_s26, 2 }
   0xf   : > { %p54_p5 = scmp.ne.s32.totalorder %s2723_s16, %s2719_s15  ;;  %p55_p6 = scmp.eq.s32.totalorder %s2195_s23, 0 }
  0x10   : > { %p158_p7 = scmp.eq.s32.totalorder %s2195_s23, 3  ;;  %s4024_s26 = smov (%p34_p4, %s4022_s26), 0 }
  0x11   : > { %3986 = sst [smem:[#allocation12_spill]] %s4024_s26  ;;  %p2842_p8 = por %p55_p6, %p54_p5 }
  0x12   : > { %p2846_p9 = por %p158_p7, %p48_p1  ;;  %s36_s6 = ssub.s32 %s2743_s21, %s4024_s26 }
  0x13   : > { %p164_p10 = scmp.eq.s32.totalorder %s2196_s24, 3  ;;  %s38_s7 = sor.u32 %s37_s28, %s36_s6 }
  0x14   : > { %p39_p11 = scmp.eq.s32.totalorder %s38_s7, 0  ;;  %p2543_p13 = scmp.lt.s32.totalorder %s2747_s22, 4 }
  0x15   : > { %p2852_p12 = por %p164_p10, %p54_p5  ;;  %s184_s9 = sand.u32 1, %s2727_s17  }
  0x16   : > { %s2859_s10 = scalar_select %p39_p11, %s2727_s17, %s41_s27  }
  0x17   : > { %s2523_s11 = smul.u32 384, %s184_s9  ;;  %s2199_s12 = sshll.u32 %s2739_s20, 1 }
  0x18   : > { %3990 = sst [smem:[#allocation13_spill]] %s2859_s10  ;;  %s2524_s13 = smul.u32 192, %s2743_s21 }
  0x19   : > { %p2865_p0 = pnand %p2543_p13, %p2834_p3  ;;  %s188_s24 = scalar_lea.vmem [#allocation3], %s2523_s11 }
  0x1a   : > { %s193_s23 = sadd.s32 %s2524_s13, %s2199_s12  ;;  %s198_s28 = sshll.u32 %s188_s24, 4  ;;  %s199_s28 = int_to_ptr.vmem [resolvable:$true] %s198_s28 }
  0x1b   : > { %s2200_s6 = sshll.u32 %s193_s23, 2  ;;  %p2201_p1 = scmp.ge.s32.totalorder %s2747_s22, 1 }
  0x1c   : > { %s195_s27 = scalar_lea.hbm %s3967_s0, %s2200_s6  ;;  %s185_s21 = scalar_lea.sflag [#allocation4], %s184_s9 }
  0x1d   : > { %s196_s25 = sshll.u32 %s195_s27, 4  ;;  %s2749_s29 = smov 256   ;;  %s197_s25 = int_to_ptr.hbm [resolvable:$true] %s196_s25 }
  0x1e   : > { %s2750_s20 = smov 128   ;;  %s2751_s10 = smov 8  }
  0x1f   : > { %2538 = dma.hbm_to_vmem [thread:$0]  (!%p2865_p0), %s197_s25, 6144, %s199_s28, %s185_s21, %s2749_s29, %s2750_s20, %s2751_s10  }
  0x20   : > { %p230_p2 = scmp.lt.s32.totalorder %s2747_s22, 5 }
  0x22   : > { %p231_p3 = pnand %p2201_p1, %p230_p2 }
  0x24   : > { %234 = sbr.rel (%p231_p3) target bundleno = 380 (0x17c), region = 36 }
  0x29   : > { %s2877_s11 = sand.u32 1, %s2723_s16  }
  0x2a   : > { %s2525_s26 = smul.u32 384, %s2877_s11  ;;  %s237_s12 = scalar_lea.sflag [#allocation4], %s2877_s11 }
  0x2c   : > { %s2881_s13 = scalar_lea.vmem [#allocation3], %s2525_s26 }
  0x2d   : > { %2710 = dma.done.wait (%p2842_p8), %s237_s12, 6144  }
  0x2e   : > { %2712 = vsyncadd (%p2842_p8), %s237_s12, 4294961152  ;;  %p282_p4 = scmp.lt.s32.totalorder %s2735_s19, 1  ;;  %v2752_v0 = vmov 0   ;;  %v2219_v1 = vld [vmem:[%s2881_s13 + $0x10] sm:$0xf]  ;;  %vm334_vm0 = vcmask 261120  }
  0x2f   : > { %2616 = vset.pattern.permute.xlu0 %v2752_v0  ;;  %2617 = vset.pattern.permute.xlu1 %v2752_v0  ;;  %v2478_v2 = vld [vmem:[%s2881_s13 + $0x14] sm:$0xf0]  ;;  %v2477_v3 = vld [vmem:[%s2881_s13 + $0x14] sm:$0xf]  ;;  %v2221_v5 = vld [vmem:[%s2881_s13 + $0x18] sm:$0xf0] }
  0x30   : > { %s2889_s20 = scalar_select %p282_p4, %s2735_s19, 1  ;;  %2618 = vset.pattern.permute.xlu2 %v2752_v0  ;;  %v2220_v4 = vor.u32 %v2478_v2, %v2219_v1  ;;  %v2239_v6 = vld [vmem:[%s2881_s13 + $0x30] sm:$0xf]  ;;  %v2482_v7 = vld [vmem:[%s2881_s13 + $0x34] sm:$0xf0]  ;;  %v2224_v8 = vor.u32 %v2477_v3, %v2221_v5 }
  0x31   : > { %v2240_v9 = vor.u32 %v2482_v7, %v2239_v6  ;;  %v2481_v10 = vld [vmem:[%s2881_s13 + $0x34] sm:$0xf]  ;;  %v2241_v11 = vld [vmem:[%s2881_s13 + $0x38] sm:$0xf0]  ;;  %v2211_v12 = vld [vmem:[%s2881_s13] sm:$0xf] }
  0x32   : > { %s2527_s21 = smul.u32 12, %s2889_s20  ;;  %347 = vmatpush.bf16.msra.mxu0 %v2220_v4  ;;  %v2244_v13 = vor.u32 %v2481_v10, %v2241_v11  ;;  %v2476_v14 = vld [vmem:[%s2881_s13 + $0x4] sm:$0xf0]  ;;  %v2475_v15 = vld [vmem:[%s2881_s13 + $0x4] sm:$0xf]  ;;  %365 = vmatpush.bf16.msra.mxu1 %v2224_v8  ;;  %s2669_s6 = scalar_lea.hbm %s3971_s4, 768 }
  0x33   : > { %s2529_s25 = smul.u32 24, %s2889_s20  ;;  %v2213_v16 = vld [vmem:[%s2881_s13 + $0x8] sm:$0xf0]  ;;  %413 = vmatpush.bf16.msra.mxu2 %v2240_v9  ;;  %v2212_v17 = vor.u32 %v2476_v14, %v2211_v12  ;;  %v2231_v19 = vld [vmem:[%s2881_s13 + $0x20] sm:$0xf] }
  0x34   : > { %s2905_s10 = scalar_lea.vmem %s3968_s1, %s2527_s21  ;;  %v2216_v18 = vor.u32 %v2475_v15, %v2213_v16  ;;  %v2480_v20 = vld [vmem:[%s2881_s13 + $0x24] sm:$0xf0]  ;;  %v2479_v21 = vld [vmem:[%s2881_s13 + $0x24] sm:$0xf]  ;;  %431 = vmatpush.bf16.msra.mxu3 %v2244_v13  ;;  %v2233_v23 = vld [vmem:[%s2881_s13 + $0x28] sm:$0xf0] }
  0x35   : > { %v2232_v22 = vor.u32 %v2480_v20, %v2231_v19  ;;  %v2915_v24 = vld [vmem:[%s2905_s10] sm:$0xff]  ;;  %v2279_v25 = vld [vmem:[%s2881_s13 + $0x70] sm:$0xf]  ;;  %v2236_v26 = vor.u32 %v2479_v21, %v2233_v23  ;;  %v2490_v27 = vld [vmem:[%s2881_s13 + $0x74] sm:$0xf0]  ;;  %s2926_s24 = scalar_lea.vmem %s3970_s3, %s2529_s25  ;;  %s2528_s28 = smul.u32 120, %s2889_s20 }
  0x36   : > { %v2489_v28 = vld [vmem:[%s2881_s13 + $0x74] sm:$0xf]  ;;  %v2281_v29 = vld [vmem:[%s2881_s13 + $0x78] sm:$0xf0]  ;;  %348 = vmatpush.bf16.msra.mxu0 %v2212_v17  ;;  %v2280_v30 = vor.u32 %v2490_v27, %v2279_v25  ;;  %v2259_v32 = vld [vmem:[%s2881_s13 + $0x50] sm:$0xf]  ;;  %366 = vmatpush.bf16.msra.mxu1 %v2216_v18 }
  0x37   : > { %v2284_v31 = vor.u32 %v2489_v28, %v2281_v29  ;;  %v2486_v33 = vld [vmem:[%s2881_s13 + $0x54] sm:$0xf0]  ;;  %414 = vmatpush.bf16.msra.mxu2 %v2232_v22  ;;  %v2485_v34 = vld [vmem:[%s2881_s13 + $0x54] sm:$0xf]  ;;  %v2261_v35 = vld [vmem:[%s2881_s13 + $0x58] sm:$0xf0]  ;;  %s2960_s27 = scalar_lea.vmem %s3969_s2, %s2528_s28 }
  0x38   : > { %432 = vmatpush.bf16.msra.mxu3 %v2236_v26  ;;  %v1135_v36 = vld [vmem:[%s2926_s24] sm:$0xff]  ;;  %v2260_v37 = vor.u32 %v2486_v33, %v2259_v32  ;;  %v2264_v38 = vor.u32 %v2485_v34, %v2261_v35  ;;  %v2488_v40 = vld [vmem:[%s2881_s13 + $0x64] sm:$0xf0]  ;;  %v1137_v42 = vld [vmem:[%s2926_s24 + $0x10] sm:$0xff]  ;;  %s2526_s29 = smul.u32 192, %s2877_s11 }
  0x39   : > { %2225 = vmatmul.msk.bf16.vlgmr.msra.gmra.mxu0 %vm334_vm0, %v2915_v24  ;;  %v2271_v39 = vld [vmem:[%s2881_s13 + $0x60] sm:$0xf]  ;;  %v2487_v41 = vld [vmem:[%s2881_s13 + $0x64] sm:$0xf]  ;;  %2227 = vmatmul.msk.bf16.vlgmr.msra.gmra.mxu1 %vm334_vm0, %v2915_v24  ;;  %v2273_v44 = vld [vmem:[%s2881_s13 + $0x68] sm:$0xf0] }
  0x3a   : > { %2245 = vmatmul.msk.bf16.vlgmr.msra.gmra.mxu2 %vm334_vm0, %v2915_v24  ;;  %v2272_v43 = vor.u32 %v2488_v40, %v2271_v39  ;;  %v2251_v45 = vld [vmem:[%s2881_s13 + $0x40] sm:$0xf]  ;;  %1140 = vperm.xlu0 %2616, %v1135_v36   ;;  %v2276_v46 = vor.u32 %v2487_v41, %v2273_v44  ;;  %v2484_v47 = vld [vmem:[%s2881_s13 + $0x44] sm:$0xf0]  ;;  %v2483_v48 = vld [vmem:[%s2881_s13 + $0x44] sm:$0xf] }
  0x3b   : > { %547 = vmatpush.bf16.msrb.mxu2 %v2280_v30  ;;  %2247 = vmatmul.msk.bf16.vlgmr.msra.gmra.mxu3 %vm334_vm0, %v2915_v24  ;;  %v2253_v49 = vld [vmem:[%s2881_s13 + $0x48] sm:$0xf0]  ;;  %v301_v50 = vld [vmem:[%s2905_s10 + $0x8] sm:$0xf]  ;;  %v2252_v51 = vor.u32 %v2484_v47, %v2251_v45  ;;  %v2319_v53 = vld [vmem:[%s2881_s13 + $0xb0] sm:$0xf] }
  0x3c   : > { %565 = vmatpush.bf16.msrb.mxu3 %v2284_v31  ;;  %480 = vmatpush.bf16.msrb.mxu0 %v2260_v37  ;;  %v2256_v52 = vor.u32 %v2483_v48, %v2253_v49  ;;  %v2498_v54 = vld [vmem:[%s2881_s13 + $0xb4] sm:$0xf0]  ;;  %v2497_v56 = vld [vmem:[%s2881_s13 + $0xb4] sm:$0xf]  ;;  %v2321_v57 = vld [vmem:[%s2881_s13 + $0xb8] sm:$0xf0]  ;;  %v311_v3 = vunpack.c.l.b16 %v301_v50 }
  0x3d   : > { %498 = vmatpush.bf16.msrb.mxu1 %v2264_v38  ;;  %1150 = vperm.xlu1 %2617, %v1137_v42   ;;  %v2320_v55 = vor.u32 %v2498_v54, %v2319_v53  ;;  %v2299_v58 = vld [vmem:[%s2881_s13 + $0x90] sm:$0xf]  ;;  %v2324_v59 = vor.u32 %v2497_v56, %v2321_v57  ;;  %v2494_v60 = vld [vmem:[%s2881_s13 + $0x94] sm:$0xf0]  ;;  %v2493_v61 = vld [vmem:[%s2881_s13 + $0x94] sm:$0xf] }
  0x3e   : > { %v2301_v62 = vld [vmem:[%s2881_s13 + $0x98] sm:$0xf0]  ;;  %v2300_v63 = vor.u32 %v2494_v60, %v2299_v58  ;;  %v1121_v1 = vld [vmem:[%s2960_s27 + $0x8] sm:$0xff]  ;;  %v1120_v4 = vld [vmem:[%s2960_s27] sm:$0xff]  ;;  %v2968_v5 = vpack.c.b16 %v311_v3, %v311_v3  ;;  %s3330_s26 = scalar_lea.vmem [#allocation6], %s2526_s29  ;;  %s2530_s12 = smul.u32 96, %s2735_s19 }
  0x3f   : > { %548 = vmatpush.bf16.msrb.mxu2 %v2272_v43  ;;  %v2304_v0 = vor.u32 %v2493_v61, %v2301_v62  ;;  %v1136_v2 = vld [vmem:[%s2926_s24 + $0x8] sm:$0xff]  ;;  %1166 = vperm.xlu2 %2618, %v1121_v1   ;;  %v1123_v6 = vld [vmem:[%s2960_s27 + $0x18] sm:$0xff]  ;;  %v1124_v7 = vld [vmem:[%s2960_s27 + $0x20] sm:$0xff]  ;;  %s2066_s30 = sshll.u32 %s3330_s26, 4  ;;  %s2052_s10 = scalar_lea.sflag [#allocation5], %s2877_s11  ;;  %s2067_s30 = int_to_ptr.vmem [resolvable:$true] %s2066_s30 }
  0x40   : > { %566 = vmatpush.bf16.msrb.mxu3 %v2276_v46  ;;  %481 = vmatpush.bf16.msrb.mxu0 %v2252_v51  ;;  %v2311_v8 = vld [vmem:[%s2881_s13 + $0xa0] sm:$0xf]  ;;  %v2496_v9 = vld [vmem:[%s2881_s13 + $0xa4] sm:$0xf0]  ;;  %v2495_v10 = vld [vmem:[%s2881_s13 + $0xa4] sm:$0xf] }
  0x41   : > { %499 = vmatpush.bf16.msrb.mxu1 %v2256_v52  ;;  %v2312_v11 = vor.u32 %v2496_v9, %v2311_v8  ;;  %v2313_v12 = vld [vmem:[%s2881_s13 + $0xa8] sm:$0xf0]  ;;  %v1122_v13 = vld [vmem:[%s2960_s27 + $0x10] sm:$0xff]  ;;  %v2291_v15 = vld [vmem:[%s2881_s13 + $0x80] sm:$0xf] }
  0x42   : > { %1145 = vperm.xlu0 %2616, %v1136_v2   ;;  %v2316_v14 = vor.u32 %v2495_v10, %v2313_v12  ;;  %v2492_v16 = vld [vmem:[%s2881_s13 + $0x84] sm:$0xf0]  ;;  %v2491_v18 = vld [vmem:[%s2881_s13 + $0x84] sm:$0xf]  ;;  %v2293_v19 = vld [vmem:[%s2881_s13 + $0x88] sm:$0xf0] }
  0x43   : > { %681 = vmatpush.bf16.msra.mxu2 %v2320_v55  ;;  %v2292_v17 = vor.u32 %v2492_v16, %v2291_v15  ;;  %v2296_v20 = vor.u32 %v2491_v18, %v2293_v19  ;;  %v1126_v21 = vld [vmem:[%s2960_s27 + $0x30] sm:$0xff]  ;;  %v1127_v22 = vld [vmem:[%s2960_s27 + $0x38] sm:$0xff]  ;;  %v1125_v23 = vld [vmem:[%s2960_s27 + $0x28] sm:$0xff] }
  0x44   : > { %699 = vmatpush.bf16.msra.mxu3 %v2324_v59  ;;  %614 = vmatpush.bf16.msra.mxu0 %v2300_v63  ;;  %v1129_v25 = vld [vmem:[%s2960_s27 + $0x48] sm:$0xff]  ;;  %v1130_v26 = vld [vmem:[%s2960_s27 + $0x50] sm:$0xff]  ;;  %v2506_v28 = vld [vmem:[%s2881_s13 + $0xf4] sm:$0xf0] }
  0x45   : > { %632 = vmatpush.bf16.msra.mxu1 %v2304_v0  ;;  %1161 = vperm.xlu1 %2617, %v1120_v4   ;;  %v2359_v27 = vld [vmem:[%s2881_s13 + $0xf0] sm:$0xf]  ;;  %v2505_v29 = vld [vmem:[%s2881_s13 + $0xf4] sm:$0xf]  ;;  %v2361_v31 = vld [vmem:[%s2881_s13 + $0xf8] sm:$0xf0] }
  0x46   : > { %v2360_v30 = vor.u32 %v2506_v28, %v2359_v27  ;;  %v2339_v32 = vld [vmem:[%s2881_s13 + $0xd0] sm:$0xf]  ;;  %v2502_v33 = vld [vmem:[%s2881_s13 + $0xd4] sm:$0xf0]  ;;  %v2364_v34 = vor.u32 %v2505_v29, %v2361_v31  ;;  %v2501_v36 = vld [vmem:[%s2881_s13 + $0xd4] sm:$0xf] }
  0x47   : > { %1171 = vperm.xlu2 %2618, %v1122_v13   ;;  %682 = vmatpush.bf16.msra.mxu2 %v2312_v11  ;;  %v2340_v35 = vor.u32 %v2502_v33, %v2339_v32  ;;  %v2341_v37 = vld [vmem:[%s2881_s13 + $0xd8] sm:$0xf0]  ;;  %v1132_v39 = vld [vmem:[%s2960_s27 + $0x60] sm:$0xff]  ;;  %v2504_v41 = vld [vmem:[%s2881_s13 + $0xe4] sm:$0xf0] }
  0x48   : > { %700 = vmatpush.bf16.msra.mxu3 %v2316_v14  ;;  %615 = vmatpush.bf16.msra.mxu0 %v2292_v17  ;;  %v2344_v38 = vor.u32 %v2501_v36, %v2341_v37  ;;  %v2351_v40 = vld [vmem:[%s2881_s13 + $0xe0] sm:$0xf]  ;;  %v2503_v42 = vld [vmem:[%s2881_s13 + $0xe4] sm:$0xf]  ;;  %v2353_v44 = vld [vmem:[%s2881_s13 + $0xe8] sm:$0xf0] }
  0x49   : > { %2226 = vmatmul.msk.bf16.gmra.mxu0 %vm334_vm0, %v2968_v5  ;;  %2228 = vmatmul.msk.bf16.gmra.mxu1 %vm334_vm0, %v2968_v5  ;;  %v2352_v43 = vor.u32 %v2504_v41, %v2351_v40  ;;  %v1128_v45 = vld [vmem:[%s2960_s27 + $0x40] sm:$0xff]  ;;  %v1133_v46 = vld [vmem:[%s2960_s27 + $0x68] sm:$0xff]  ;;  %v2356_v47 = vor.u32 %v2503_v42, %v2353_v44  ;;  %v1131_v54 = vld [vmem:[%s2960_s27 + $0x58] sm:$0xff] }
  0x4a   : > { %2246 = vmatmul.msk.bf16.gmra.mxu2 %vm334_vm0, %v2968_v5  ;;  %1194 = vperm.xlu0 %2616, %v1123_v6   ;;  %v2331_v48 = vld [vmem:[%s2881_s13 + $0xc0] sm:$0xf]  ;;  %v2500_v49 = vld [vmem:[%s2881_s13 + $0xc4] sm:$0xf0]  ;;  %v2499_v50 = vld [vmem:[%s2881_s13 + $0xc4] sm:$0xf] }
  0x4b   : > { %2248 = vmatmul.msk.bf16.gmra.mxu3 %vm334_vm0, %v2968_v5  ;;  %633 = vmatpush.bf16.msra.mxu1 %v2296_v20  ;;  %v2332_v51 = vor.u32 %v2500_v49, %v2331_v48  ;;  %v2333_v52 = vld [vmem:[%s2881_s13 + $0xc8] sm:$0xf0]  ;;  %v2399_v55 = vld [vmem:[%s2881_s13 + $0x130] sm:$0xf]  ;;  %v2514_v56 = vld [vmem:[%s2881_s13 + $0x134] sm:$0xf0] }
  0x4c   : > { %v2336_v53 = vor.u32 %v2499_v50, %v2333_v52  ;;  %v2513_v57 = vld [vmem:[%s2881_s13 + $0x134] sm:$0xf]  ;;  %v2400_v58 = vor.u32 %v2514_v56, %v2399_v55  ;;  %v2401_v59 = vld [vmem:[%s2881_s13 + $0x138] sm:$0xf0]  ;;  %v2379_v60 = vld [vmem:[%s2881_s13 + $0x110] sm:$0xf] }
  0x4d   : > { %1199 = vperm.xlu1 %2617, %v1124_v7   ;;  %v2510_v61 = vld [vmem:[%s2881_s13 + $0x114] sm:$0xf0]  ;;  %v2404_v62 = vor.u32 %v2513_v57, %v2401_v59  ;;  %v2509_v0 = vld [vmem:[%s2881_s13 + $0x114] sm:$0xf]  ;;  %v2381_v1 = vld [vmem:[%s2881_s13 + $0x118] sm:$0xf0] }
  0x4e   : > { %v2380_v63 = vor.u32 %v2510_v61, %v2379_v60  ;;  %v2384_v2 = vor.u32 %v2509_v0, %v2381_v1  ;;  %v2391_v3 = vld [vmem:[%s2881_s13 + $0x120] sm:$0xf]  ;;  %v2512_v4 = vld [vmem:[%s2881_s13 + $0x124] sm:$0xf0]  ;;  %v2511_v6 = vld [vmem:[%s2881_s13 + $0x124] sm:$0xf] }
  0x4f   : > { %1204 = vperm.xlu2 %2618, %v1125_v23   ;;  %v2392_v7 = vor.u32 %v2512_v4, %v2391_v3  ;;  %v2393_v8 = vld [vmem:[%s2881_s13 + $0x128] sm:$0xf0]  ;;  %v1134_v10 = vld [vmem:[%s2960_s27 + $0x70] sm:$0xff]  ;;  %v2371_v11 = vld [vmem:[%s2881_s13 + $0x100] sm:$0xf] }
  0x50   : > { %v2396_v9 = vor.u32 %v2511_v6, %v2393_v8  ;;  %v2508_v12 = vld [vmem:[%s2881_s13 + $0x104] sm:$0xf0]  ;;  %v2507_v14 = vld [vmem:[%s2881_s13 + $0x104] sm:$0xf]  ;;  %v2373_v15 = vld [vmem:[%s2881_s13 + $0x108] sm:$0xf0] }
  0x51   : > { %v2372_v13 = vor.u32 %v2508_v12, %v2371_v11  ;;  %v2376_v16 = vor.u32 %v2507_v14, %v2373_v15  ;;  %v2439_v17 = vld [vmem:[%s2881_s13 + $0x170] sm:$0xf]  ;;  %v2522_v18 = vld [vmem:[%s2881_s13 + $0x174] sm:$0xf0]  ;;  %v2521_v19 = vld [vmem:[%s2881_s13 + $0x174] sm:$0xf] }
  0x52   : > { %1227 = vperm.xlu0 %2616, %v1126_v21   ;;  %v2440_v20 = vor.u32 %v2522_v18, %v2439_v17  ;;  %v2441_v21 = vld [vmem:[%s2881_s13 + $0x178] sm:$0xf0]  ;;  %v2419_v23 = vld [vmem:[%s2881_s13 + $0x150] sm:$0xf]  ;;  %v2520_v31 = vld [vmem:[%s2881_s13 + $0x164] sm:$0xf0] }
  0x53   : > { %v2421_v28 = vld [vmem:[%s2881_s13 + $0x158] sm:$0xf0]  ;;  %v2519_v32 = vld [vmem:[%s2881_s13 + $0x164] sm:$0xf]  ;;  %v2411_v36 = vld [vmem:[%s2881_s13 + $0x140] sm:$0xf] }
  0x54   : > { %v2516_v37 = vld [vmem:[%s2881_s13 + $0x144] sm:$0xf0]  ;;  %v2413_v40 = vld [vmem:[%s2881_s13 + $0x148] sm:$0xf0] }
  0x55   : > { %1232 = vperm.xlu1 %2617, %v1127_v22   ;;  %v2444_v22 = vor.u32 %v2521_v19, %v2441_v21 }
  0x57   : > { %1237 = vperm.xlu2 %2618, %v1128_v45  }
  0x59   : > { %2265 = vmatmul.msk.bf16.vlgmr.msrb.gmra.mxu0 %vm334_vm0, %v2915_v24  ;;  %2267 = vmatmul.msk.bf16.vlgmr.msrb.gmra.mxu1 %vm334_vm0, %v2915_v24 }
  0x5a   : > { %2285 = vmatmul.msk.bf16.vlgmr.msrb.gmra.mxu2 %vm334_vm0, %v2915_v24  ;;  %1260 = vperm.xlu0 %2616, %v1129_v25   ;;  %v2518_v25 = vld [vmem:[%s2881_s13 + $0x154] sm:$0xf0] }
  0x5b   : > { %2287 = vmatmul.msk.bf16.vlgmr.msrb.gmra.mxu3 %vm334_vm0, %v2915_v24  ;;  %815 = vmatpush.bf16.msrb.mxu2 %v2360_v30  ;;  %v2420_v27 = vor.u32 %v2518_v25, %v2419_v23  ;;  %v2431_v30 = vld [vmem:[%s2881_s13 + $0x160] sm:$0xf] }
  0x5c   : > { %833 = vmatpush.bf16.msrb.mxu3 %v2364_v34  ;;  %748 = vmatpush.bf16.msrb.mxu0 %v2340_v35  ;;  %v2432_v33 = vor.u32 %v2520_v31, %v2431_v30  ;;  %v2433_v34 = vld [vmem:[%s2881_s13 + $0x168] sm:$0xf0] }
  0x5d   : > { %1265 = vperm.xlu1 %2617, %v1130_v26   ;;  %766 = vmatpush.bf16.msrb.mxu1 %v2344_v38  ;;  %v2517_v26 = vld [vmem:[%s2881_s13 + $0x154] sm:$0xf]  ;;  %v2436_v35 = vor.u32 %v2519_v32, %v2433_v34  ;;  %v2515_v38 = vld [vmem:[%s2881_s13 + $0x144] sm:$0xf]  ;;  %s2470_s13 = sshll.u32 %s2731_s18, 1 }
  0x5e   : > { %v2424_v29 = vor.u32 %v2517_v26, %v2421_v28  ;;  %v2416_v41 = vor.u32 %v2515_v38, %v2413_v40  ;;  %s2063_s18 = sadd.s32 %s2530_s12, %s2470_s13 }
  0x5f   : > { %816 = vmatpush.bf16.msrb.mxu2 %v2352_v43  ;;  %1270 = vperm.xlu2 %2618, %v1131_v54   ;;  %s2471_s19 = sshll.u32 %s2063_s18, 2 }
  0x60   : > { %834 = vmatpush.bf16.msrb.mxu3 %v2356_v47  ;;  %749 = vmatpush.bf16.msrb.mxu0 %v2332_v51  ;;  %s2065_s25 = scalar_lea.hbm %s3971_s4, %s2471_s19 }
  0x61   : > { %767 = vmatpush.bf16.msrb.mxu1 %v2336_v53  ;;  %s2068_s9 = sshll.u32 %s2065_s25, 4  ;;  %s2069_s9 = int_to_ptr.hbm [resolvable:$true] %s2068_s9 }
  0x62   : > { %1293 = vperm.xlu0 %2616, %v1132_v39   ;;  %v2412_v39 = vor.u32 %v2516_v37, %v2411_v36  ;;  %s2663_s14 = sshra.s32 %s2069_s9, 4  ;;  %s2664_s14 = int_to_ptr.hbm [resolvable:$true] %s2663_s14 }
  0x63   : > { %s2665_s23 = scalar_lea.hbm %s2664_s14, 192  ;;  %p2670_p8 = scmp.lt.s32.totalorder %s2664_s14, %s3971_s4 }
  0x64   : > { %p2666_p5 = scmp.ne.s32.totalorder %s2664_s14, %s2665_s23  ;;  %p2671_p10 = scmp.lt.s32.totalorder %s2669_s6, %s2665_s23 }
  0x65   : > { %1298 = vperm.xlu1 %2617, %v1133_v46  }
  0x66   : > { %p2667_p6 = pnand %p2666_p5, %p2846_p9  ;;  %p2672_p11 = por %p2671_p10, %p2670_p8 }
  0x67   : > { %1303 = vperm.xlu2 %2618, %v1134_v10  }
  0x68   : > { %p2668_p7 = pneg %p2667_p6 }
  0x69   : > { %2266 = vmatmul.msk.bf16.gmra.mxu0 %vm334_vm0, %v2968_v5  ;;  %2268 = vmatmul.msk.bf16.gmra.mxu1 %vm334_vm0, %v2968_v5 }
  0x6a   : > { %2286 = vmatmul.msk.bf16.gmra.mxu2 %vm334_vm0, %v2968_v5  ;;  %p2673_p13 = pnand %p2672_p11, %p2668_p7 }
  0x6b   : > { %2288 = vmatmul.msk.bf16.gmra.mxu3 %vm334_vm0, %v2968_v5 }
  0x79   : > { %2305 = vmatmul.msk.bf16.vlgmr.msra.gmra.mxu0 %vm334_vm0, %v2915_v24  ;;  %2307 = vmatmul.msk.bf16.vlgmr.msra.gmra.mxu1 %vm334_vm0, %v2915_v24 }
  0x7a   : > { %2325 = vmatmul.msk.bf16.vlgmr.msra.gmra.mxu2 %vm334_vm0, %v2915_v24  ;;  %882 = vmatpush.bf16.msra.mxu0 %v2380_v63 }
  0x7b   : > { %2327 = vmatmul.msk.bf16.vlgmr.msra.gmra.mxu3 %vm334_vm0, %v2915_v24  ;;  %949 = vmatpush.bf16.msra.mxu2 %v2400_v58 }
  0x7c   : > { %967 = vmatpush.bf16.msra.mxu3 %v2404_v62  ;;  %900 = vmatpush.bf16.msra.mxu1 %v2384_v2 }
  0x7e   : > { %883 = vmatpush.bf16.msra.mxu0 %v2372_v13 }
  0x7f   : > { %950 = vmatpush.bf16.msra.mxu2 %v2392_v7 }
  0x80   : > { %968 = vmatpush.bf16.msra.mxu3 %v2396_v9  ;;  %901 = vmatpush.bf16.msra.mxu1 %v2376_v16 }
  0x89   : > { %2306 = vmatmul.msk.bf16.gmra.mxu0 %vm334_vm0, %v2968_v5  ;;  %2308 = vmatmul.msk.bf16.gmra.mxu1 %vm334_vm0, %v2968_v5 }
  0x8a   : > { %2326 = vmatmul.msk.bf16.gmra.mxu2 %vm334_vm0, %v2968_v5 }
  0x8b   : > { %2328 = vmatmul.msk.bf16.gmra.mxu3 %vm334_vm0, %v2968_v5 }
  0x99   : > { %2345 = vmatmul.msk.bf16.vlgmr.msrb.gmra.mxu0 %vm334_vm0, %v2915_v24  ;;  %2347 = vmatmul.msk.bf16.vlgmr.msrb.gmra.mxu1 %vm334_vm0, %v2915_v24  ;;  %v3117_v59 = vpop.permute.xlu2 %1166 }
  0x9a   : > { %2365 = vmatmul.msk.bf16.vlgmr.msrb.gmra.mxu2 %vm334_vm0, %v2915_v24  ;;  %1016 = vmatpush.bf16.msrb.mxu0 %v2420_v27 }
  0x9b   : > { %2367 = vmatmul.msk.bf16.vlgmr.msrb.gmra.mxu3 %vm334_vm0, %v2915_v24  ;;  %1083 = vmatpush.bf16.msrb.mxu2 %v2440_v20 }
  0x9c   : > { %1101 = vmatpush.bf16.msrb.mxu3 %v2444_v22  ;;  %1034 = vmatpush.bf16.msrb.mxu1 %v2424_v29 }
  0x9e   : > { %1017 = vmatpush.bf16.msrb.mxu0 %v2412_v39 }
  0x9f   : > { %1084 = vmatpush.bf16.msrb.mxu2 %v2432_v33 }
  0xa0   : > { %1102 = vmatpush.bf16.msrb.mxu3 %v2436_v35  ;;  %1035 = vmatpush.bf16.msrb.mxu1 %v2416_v41 }
  0xa1   : > { %v3133_v2 = vpop.permute.xlu2 %1171 }
  0xa2   : > { %3993 = vst [vmem:[#allocation15_spill] sm:$0xff] %v3133_v2 }
  0xa9   : > { %2346 = vmatmul.msk.bf16.gmra.mxu0 %vm334_vm0, %v2968_v5  ;;  %2348 = vmatmul.msk.bf16.gmra.mxu1 %vm334_vm0, %v2968_v5  ;;  %v3164_v23 = vpop.permute.xlu2 %1204 }
  0xaa   : > { %2366 = vmatmul.msk.bf16.gmra.mxu2 %vm334_vm0, %v2968_v5  ;;  %3994 = vst [vmem:[#allocation16_spill] sm:$0xff] %v3164_v23 }
  0xab   : > { %2368 = vmatmul.msk.bf16.gmra.mxu3 %vm334_vm0, %v2968_v5 }
  0xac   : > { %v3103_v48 = vpop.permute.xlu0 %1140 }
  0xaf   : > { %v3115_v58 = vpop.permute.xlu1 %1150 }
  0xb0   : > { %3992 = vst [vmem:[#allocation14_spill] sm:$0xff] %v3115_v58 }
  0xb4   : > { %v3113_v57 = vpop.permute.xlu0 %1145 }
  0xb6   : > { %v350_v42 = vpop.f32.mrf.mxu0  ;;  %v368_v43 = vpop.f32.mrf.mxu1 }
  0xb7   : > { %v3129_v1 = vpop.permute.xlu1 %1161 }
  0xb8   : > { %v1174_v8 = vmul.f32 %v3129_v1, %v350_v42  ;;  %v1175_v10 = vmul.f32 %v3129_v1, %v368_v43 }
  0xb9   : > { %2385 = vmatmul.msk.bf16.vlgmr.msra.gmra.mxu0 %vm334_vm0, %v2915_v24  ;;  %2387 = vmatmul.msk.bf16.vlgmr.msra.gmra.mxu1 %vm334_vm0, %v2915_v24 }
  0xba   : > { %2405 = vmatmul.msk.bf16.vlgmr.msra.gmra.mxu2 %vm334_vm0, %v2915_v24  ;;  %v1181_v20 = vadd.f32 %v1175_v10, %v3103_v48 }
  0xbb   : > { %2407 = vmatmul.msk.bf16.vlgmr.msra.gmra.mxu3 %vm334_vm0, %v2915_v24 }
  0xbc   : > { %v3123_v0 = vpop.permute.xlu0 %1194 }
  0xbd   : > { %v416_v44 = vpop.f32.mrf.mxu2 }
  0xbe   : > { %v434_v45 = vpop.f32.mrf.mxu3  ;;  %v352_v46 = vpop.f32.mrf.mxu0  ;;  %v1207_v12 = vmul.f32 %v3123_v0, %v416_v44  ;;  %v1336_v13 = vmul.f32 %v3129_v1, %v416_v44 }
  0xbf   : > { %v370_v47 = vpop.f32.mrf.mxu1  ;;  %v3147_v11 = vpop.permute.xlu1 %1199  ;;  %v1176_v14 = vmul.f32 %v3117_v59, %v352_v46  ;;  %v1208_v21 = vmul.f32 %v3123_v0, %v434_v45  ;;  %v1337_v28 = vmul.f32 %v3129_v1, %v434_v45 }
  0xc0   : > { %v1177_v15 = vmul.f32 %v3117_v59, %v370_v47  ;;  %v1342_v27 = vadd.f32 %v1336_v13, %v3103_v48 }
  0xc1   : > { %v1182_v29 = vadd.f32 %v1176_v14, %v3113_v57  ;;  %v1214_v42 = vadd.f32 %v1208_v21, %v1181_v20  ;;  %v1343_v43 = vadd.f32 %v1337_v28, %v3103_v48 }
  0xc2   : > { %v1183_v30 = vadd.f32 %v1177_v15, %v3113_v57 }
  0xc4   : > { %v3144_v9 = vpop.permute.xlu0 %1227 }
  0xc5   : > { %v418_v49 = vpop.f32.mrf.mxu2 }
  0xc6   : > { %v436_v50 = vpop.f32.mrf.mxu3  ;;  %v355_v51 = vpop.f32.mrf.mxu0  ;;  %v1209_v31 = vmul.f32 %v3147_v11, %v418_v49  ;;  %v1338_v32 = vmul.f32 %v3117_v59, %v418_v49 }
  0xc7   : > { %v373_v52 = vpop.f32.mrf.mxu1  ;;  %v1178_v17 = vmul.f32 %v3133_v2, %v355_v51  ;;  %v1210_v33 = vmul.f32 %v3147_v11, %v436_v50  ;;  %v1339_v34 = vmul.f32 %v3117_v59, %v436_v50  ;;  %v3186_v41 = vpop.permute.xlu1 %1232 }
  0xc8   : > { %v1179_v22 = vmul.f32 %v3133_v2, %v373_v52  ;;  %v1215_v47 = vadd.f32 %v1209_v31, %v1182_v29  ;;  %v1344_v49 = vadd.f32 %v1338_v32, %v3113_v57 }
  0xc9   : > { %2386 = vmatmul.msk.bf16.gmra.mxu0 %vm334_vm0, %v2968_v5  ;;  %2388 = vmatmul.msk.bf16.gmra.mxu1 %vm334_vm0, %v2968_v5  ;;  %v1184_v35 = vadd.f32 %v1178_v17, %v3115_v58  ;;  %v1216_v50 = vadd.f32 %v1210_v33, %v1183_v30 }
  0xca   : > { %2406 = vmatmul.msk.bf16.gmra.mxu2 %vm334_vm0, %v2968_v5  ;;  %v1185_v38 = vadd.f32 %v1179_v22, %v3115_v58 }
  0xcb   : > { %2408 = vmatmul.msk.bf16.gmra.mxu3 %vm334_vm0, %v2968_v5 }
  0xcc   : > { %v3195_v46 = vpop.permute.xlu0 %1260 }
  0xcd   : > { %v421_v53 = vpop.f32.mrf.mxu2 }
  0xce   : > { %v439_v54 = vpop.f32.mrf.mxu3  ;;  %v357_v55 = vpop.f32.mrf.mxu0  ;;  %v1211_v36 = vmul.f32 %v3164_v23, %v421_v53  ;;  %v1340_v37 = vmul.f32 %v3133_v2, %v421_v53  ;;  %v1345_v53 = vadd.f32 %v1339_v34, %v3113_v57 }
  0xcf   : > { %v375_v56 = vpop.f32.mrf.mxu1  ;;  %v1212_v39 = vmul.f32 %v3164_v23, %v439_v54  ;;  %v1341_v40 = vmul.f32 %v3133_v2, %v439_v54 }
  0xd0   : > { %v3205_v54 = vadd.f32 %v1340_v37, %v3115_v58 }
  0xd4   : > { %v3248_v37 = vpop.permute.xlu0 %1293 }
  0xd5   : > { %v423_v60 = vpop.f32.mrf.mxu2 }
  0xd6   : > { %v441_v61 = vpop.f32.mrf.mxu3  ;;  %v483_v62 = vpop.f32.mrf.mxu0 }
  0xd7   : > { %v3119_v63 = vpop.f32.mrf.mxu1  ;;  %v1240_v44 = vmul.f32 %v3144_v9, %v483_v62  ;;  %v1354_v45 = vmul.f32 %v3123_v0, %v483_v62  ;;  %v1439_v51 = vmul.f32 %v3129_v1, %v483_v62  ;;  %v3211_v61 = vadd.f32 %v1212_v39, %v1185_v38 }
  0xd8   : > { %v1440_v55 = vmul.f32 %v3129_v1, %v3119_v63  ;;  %v1241_v62 = vmul.f32 %v3144_v9, %v3119_v63  ;;  %v1355_v10 = vmul.f32 %v3123_v0, %v3119_v63 }
  0xd9   : > { %2425 = vmatmul.msk.bf16.vlgmr.msrb.gmra.mxu0 %vm334_vm0, %v2915_v24  ;;  %2427 = vmatmul.msk.bf16.vlgmr.msrb.gmra.mxu1 %vm334_vm0, %v2915_v24  ;;  %v1360_v13 = vadd.f32 %v1354_v45, %v1342_v27  ;;  %v1445_v17 = vadd.f32 %v1439_v51, %v3103_v48 }
  0xda   : > { %2445 = vmatmul.msk.bf16.vlgmr.msrb.gmra.mxu2 %vm334_vm0, %v2915_v24  ;;  %v1446_v22 = vadd.f32 %v1440_v55, %v3103_v48  ;;  %v1247_v29 = vadd.f32 %v1241_v62, %v1214_v42  ;;  %v1361_v32 = vadd.f32 %v1355_v10, %v1343_v43 }
  0xdb   : > { %2447 = vmatmul.msk.bf16.vlgmr.msrb.gmra.mxu3 %vm334_vm0, %v2915_v24  ;;  %v1180_v24 = vadd.f32 %v1174_v8, %v3103_v48  ;;  %v3214_v8 = vadd.f32 %v1341_v40, %v3115_v58 }
  0xdd   : > { %v3135_v3 = vpop.f32.mrf.mxu2  ;;  %v1213_v26 = vadd.f32 %v1207_v12, %v1180_v24 }
  0xde   : > { %v3137_v4 = vpop.f32.mrf.mxu3  ;;  %v3139_v6 = vpop.f32.mrf.mxu0  ;;  %v1273_v14 = vmul.f32 %v3195_v46, %v3135_v3  ;;  %v1372_v15 = vmul.f32 %v3144_v9, %v3135_v3  ;;  %v1457_v20 = vmul.f32 %v3123_v0, %v3135_v3  ;;  %v1542_v21 = vmul.f32 %v3129_v1, %v3135_v3 }
  0xdf   : > { %v3141_v7 = vpop.f32.mrf.mxu1  ;;  %v1246_v12 = vadd.f32 %v1240_v44, %v1213_v26  ;;  %v1274_v63 = vmul.f32 %v3195_v46, %v3137_v4  ;;  %v1373_v26 = vmul.f32 %v3144_v9, %v3137_v4  ;;  %v1458_v27 = vmul.f32 %v3123_v0, %v3137_v4 }
  0xe0   : > { %v1543_v28 = vmul.f32 %v3129_v1, %v3137_v4  ;;  %v1242_v30 = vmul.f32 %v3186_v41, %v3139_v6  ;;  %v1356_v3 = vmul.f32 %v3147_v11, %v3139_v6  ;;  %v1441_v31 = vmul.f32 %v3117_v59, %v3139_v6  ;;  %v3257_v6 = vpop.permute.xlu1 %1265 }
  0xe1   : > { %v1279_v33 = vadd.f32 %v1273_v14, %v1246_v12  ;;  %v1378_v34 = vadd.f32 %v1372_v15, %v1360_v13  ;;  %v3250_v4 = vadd.f32 %v1457_v20, %v1445_v17  ;;  %v3253_v38 = vadd.f32 %v1542_v21, %v3103_v48 }
  0xe2   : > { %v1280_v39 = vadd.f32 %v1274_v63, %v1247_v29  ;;  %v1357_v40 = vmul.f32 %v3147_v11, %v3141_v7  ;;  %v1379_v43 = vadd.f32 %v1373_v26, %v1361_v32  ;;  %v3259_v44 = vadd.f32 %v1458_v27, %v1446_v22 }
  0xe3   : > { %v3262_v45 = vadd.f32 %v1543_v28, %v3103_v48  ;;  %v1442_v51 = vmul.f32 %v3117_v59, %v3141_v7  ;;  %v1248_v62 = vadd.f32 %v1242_v30, %v1215_v47  ;;  %v1362_v10 = vadd.f32 %v1356_v3, %v1344_v49 }
  0xe4   : > { %v1363_v20 = vadd.f32 %v1357_v40, %v1345_v53 }
  0xe5   : > { %v3154_v16 = vpop.f32.mrf.mxu2 }
  0xe6   : > { %v3157_v18 = vpop.f32.mrf.mxu3  ;;  %v3159_v19 = vpop.f32.mrf.mxu0  ;;  %v1275_v15 = vmul.f32 %v3257_v6, %v3154_v16  ;;  %v1459_v47 = vmul.f32 %v3147_v11, %v3154_v16  ;;  %v1544_v49 = vmul.f32 %v3117_v59, %v3154_v16 }
  0xe7   : > { %v3166_v25 = vpop.f32.mrf.mxu1  ;;  %v1276_v63 = vmul.f32 %v3257_v6, %v3157_v18  ;;  %v1375_v53 = vmul.f32 %v3186_v41, %v3157_v18  ;;  %v1460_v27 = vmul.f32 %v3147_v11, %v3157_v18  ;;  %v1545_v3 = vmul.f32 %v3117_v59, %v3157_v18 }
  0xe8   : > { %v1281_v29 = vadd.f32 %v1275_v15, %v1248_v62 }
  0xe9   : > { %2426 = vmatmul.msk.bf16.gmra.mxu0 %vm334_vm0, %v2968_v5  ;;  %2428 = vmatmul.msk.bf16.gmra.mxu1 %vm334_vm0, %v2968_v5 }
  0xea   : > { %2446 = vmatmul.msk.bf16.gmra.mxu2 %vm334_vm0, %v2968_v5 }
  0xeb   : > { %2448 = vmatmul.msk.bf16.gmra.mxu3 %vm334_vm0, %v2968_v5  ;;  %v3202_v5 = vadd.f32 %v1211_v36, %v1184_v35  ;;  %v1243_v35 = vmul.f32 %v3186_v41, %v3141_v7  ;;  %v3246_v36 = vpop.permute.xlu2 %1237  ;;  %v1374_v7 = vmul.f32 %v3186_v41, %v3154_v16 }
  0xed   : > { %v3199_v52 = vpop.f32.mrf.mxu2  ;;  %v1249_v14 = vadd.f32 %v1243_v35, %v1216_v50  ;;  %v1448_v50 = vadd.f32 %v1442_v51, %v3113_v57  ;;  %v1380_v30 = vadd.f32 %v1374_v7, %v1362_v10  ;;  %v1244_v35 = vmul.f32 %v3246_v36, %v3159_v19 }
  0xee   : > { %v3209_v56 = vpop.f32.mrf.mxu3  ;;  %v490_v60 = vpop.f32.mrf.mxu0 }
  0xef   : > { %v508_v24 = vpop.f32.mrf.mxu1 }
  0xf0   : > { %v1447_v24 = vadd.f32 %v1441_v31, %v3113_v57 }
  0xf2   : > { %v3297_v32 = vadd.f32 %v1459_v47, %v1447_v24  ;;  %v1282_v24 = vadd.f32 %v1276_v63, %v1249_v14 }
  0xf3   : > { %v3316_v15 = vpop.permute.xlu2 %1270 }
  0xf5   : > { %v557_v42 = vpop.f32.mrf.mxu2 }
  0xf6   : > { %v575_v55 = vpop.f32.mrf.mxu3  ;;  %v3266_v60 = vpop.f32.mrf.mxu0  ;;  %v1443_v42 = vmul.f32 %v3133_v2, %v3159_v19 }
  0xf7   : > { %v1306_v12 = vmul.f32 %v3248_v37, %v3266_v60  ;;  %v3271_v13 = vpop.f32.mrf.mxu1  ;;  %v1390_v22 = vmul.f32 %v3195_v46, %v3266_v60 }
  0xf8   : > { %v1307_v17 = vmul.f32 %v3248_v37, %v3271_v13  ;;  %v1391_v16 = vmul.f32 %v3195_v46, %v3271_v13 }
  0xf9   : > { %v1312_v21 = vadd.f32 %v1306_v12, %v1279_v33  ;;  %v3300_v33 = vadd.f32 %v1544_v49, %v3113_v57  ;;  %v1396_v51 = vadd.f32 %v1390_v22, %v1378_v34  ;;  %v1381_v12 = vadd.f32 %v1375_v53, %v1363_v20 }
  0xfa   : > { %v1313_v26 = vadd.f32 %v1307_v17, %v1280_v39  ;;  %v1358_v39 = vmul.f32 %v3164_v23, %v3159_v19  ;;  %v1397_v7 = vadd.f32 %v1391_v16, %v1379_v43  ;;  %v3322_v19 = vadd.f32 %v1460_v27, %v1448_v50  ;;  %v3333_v43 = vpop.permute.xlu1 %1298 }
  0xfb   : > { %v1318_v28 = vmax.f32 %v1312_v21, 0.0  ;;  %v1245_v34 = vmul.f32 %v3246_v36, %v3166_v25  ;;  %v1359_v49 = vmul.f32 %v3164_v23, %v3166_v25  ;;  %v3336_v20 = vadd.f32 %v1545_v3, %v3113_v57 }
  0xfc   : > { %v1319_v31 = vmax.f32 %v1313_v26, 0.0  ;;  %v1250_v21 = vadd.f32 %v1244_v35, %v3202_v5  ;;  %v1444_v50 = vmul.f32 %v3133_v2, %v3166_v25  ;;  %v1364_v22 = vadd.f32 %v1358_v39, %v3205_v54 }
  0xfd   : > { %v3306_v40 = vpop.f32.mrf.mxu2  ;;  %v1449_v26 = vadd.f32 %v1443_v42, %v3115_v58  ;;  %v1277_v53 = vmul.f32 %v3316_v15, %v3199_v52  ;;  %v1461_v16 = vmul.f32 %v3164_v23, %v3199_v52  ;;  %v1251_v25 = vadd.f32 %v1245_v34, %v3211_v61 }
  0xfe   : > { %v1324_v18 = vpack.c.bf16 %v1319_v31, %v1318_v28  ;;  %v1408_v55 = vmul.f32 %v3248_v37, %v3306_v40  ;;  %v3312_v62 = vpop.f32.mrf.mxu3  ;;  %v3314_v10 = vpop.f32.mrf.mxu0  ;;  %v1376_v28 = vmul.f32 %v3246_v36, %v3199_v52  ;;  %v1365_v54 = vadd.f32 %v1359_v49, %v3214_v8 }
  0xff   : > { %v1409_v17 = vmul.f32 %v3248_v37, %v3312_v62  ;;  %v3320_v47 = vpop.f32.mrf.mxu1  ;;  %v1308_v5 = vmul.f32 %v3333_v43, %v3314_v10  ;;  %v1546_v31 = vmul.f32 %v3133_v2, %v3199_v52  ;;  %v1392_v35 = vmul.f32 %v3257_v6, %v3314_v10 }
 0x100   : > { %1327 = vst [vmem:[%s3330_s26] sm:$0xff] %v1324_v18  ;;  %v1414_v14 = vadd.f32 %v1408_v55, %v1396_v51  ;;  %v1278_v39 = vmul.f32 %v3316_v15, %v3209_v56  ;;  %v1377_v42 = vmul.f32 %v3246_v36, %v3209_v56  ;;  %v1450_v61 = vadd.f32 %v1444_v50, %v3115_v58 }
 0x101   : > { %v1415_v63 = vadd.f32 %v1409_v17, %v1397_v7  ;;  %v1314_v18 = vadd.f32 %v1308_v5, %v1281_v29  ;;  %v1462_v8 = vmul.f32 %v3164_v23, %v3209_v56  ;;  %v1547_v52 = vmul.f32 %v3133_v2, %v3209_v56 }
 0x102   : > { %v1420_v27 = vmax.f32 %v1414_v14, 0.0  ;;  %v1309_v7 = vmul.f32 %v3333_v43, %v3320_v47  ;;  %v1283_v49 = vadd.f32 %v1277_v53, %v1250_v21  ;;  %v1382_v14 = vadd.f32 %v1376_v28, %v1364_v22 }
 0x103   : > { %v1421_v3 = vmax.f32 %v1415_v63, 0.0  ;;  %v3374_v29 = vadd.f32 %v1461_v16, %v1449_v26  ;;  %v1393_v50 = vmul.f32 %v3257_v6, %v3320_v47  ;;  %v3384_v2 = vadd.f32 %v1546_v31, %v3115_v58  ;;  %v3400_v31 = vpop.permute.xlu2 %1303 }
 0x104   : > { %v1315_v56 = vadd.f32 %v1309_v7, %v1282_v24  ;;  %v1284_v23 = vadd.f32 %v1278_v39, %v1251_v25  ;;  %v3386_v21 = vadd.f32 %v1377_v42, %v1365_v54  ;;  %v1645_v22 = vmul.f32 %v3129_v1, %v3266_v60 }
 0x105   : > { %v1426_v51 = vpack.c.bf16 %v1421_v3, %v1420_v27  ;;  %v3361_v55 = vpop.f32.mrf.mxu2  ;;  %v1320_v27 = vmax.f32 %v1314_v18, 0.0  ;;  %v1398_v3 = vadd.f32 %v1392_v35, %v1380_v30  ;;  %v3390_v26 = vadd.f32 %v1462_v8, %v1450_v61 }
 0x106   : > { %v3370_v17 = vpop.f32.mrf.mxu3  ;;  %v3372_v34 = vpop.f32.mrf.mxu0  ;;  %v1410_v5 = vmul.f32 %v3333_v43, %v3361_v55  ;;  %v1475_v53 = vmul.f32 %v3144_v9, %v3266_v60  ;;  %v1321_v28 = vmax.f32 %v1315_v56, 0.0  ;;  %v1560_v24 = vmul.f32 %v3123_v0, %v3266_v60 }
 0x107   : > { %2449 = vst [vmem:[%s3330_s26 + $0x18] sm:$0xff] %v1426_v51  ;;  %v3379_v63 = vpop.f32.mrf.mxu1  ;;  %v1476_v16 = vmul.f32 %v3144_v9, %v3271_v13  ;;  %v1399_v25 = vadd.f32 %v1393_v50, %v1381_v12  ;;  %v1411_v54 = vmul.f32 %v3333_v43, %v3370_v17  ;;  %v3403_v35 = vadd.f32 %v1547_v52, %v3115_v58 }
 0x108   : > { %v1416_v30 = vadd.f32 %v1410_v5, %v1398_v3  ;;  %v1561_v39 = vmul.f32 %v3123_v0, %v3271_v13  ;;  %v1646_v42 = vmul.f32 %v3129_v1, %v3271_v13  ;;  %v1325_v60 = vpack.c.bf16 %v1321_v28, %v1320_v27 }
 0x109   : > { %3995 = vst [vmem:[#allocation17_spill] sm:$0xff] %v3403_v35  ;;  %v1651_v51 = vadd.f32 %v1645_v22, %v3103_v48  ;;  %v1493_v12 = vmul.f32 %v3195_v46, %v3306_v40  ;;  %v1417_v61 = vadd.f32 %v1411_v54, %v1399_v25  ;;  %v1578_v52 = vmul.f32 %v3144_v9, %v3306_v40 }
 0x10a   : > { %v1422_v18 = vmax.f32 %v1416_v30, 0.0  ;;  %v1663_v7 = vmul.f32 %v3123_v0, %v3306_v40  ;;  %1328 = vst [vmem:[%s3330_s26 + $0x8] sm:$0xff] %v1325_v60  ;;  %v1310_v13 = vmul.f32 %v3400_v31, %v3372_v34  ;;  %v1394_v50 = vmul.f32 %v3316_v15, %v3372_v34 }
 0x10b   : > { %v1481_v56 = vadd.f32 %v1475_v53, %v3250_v4  ;;  %v1566_v5 = vadd.f32 %v1560_v24, %v3253_v38  ;;  %v1482_v22 = vadd.f32 %v1476_v16, %v3259_v44  ;;  %v1423_v28 = vmax.f32 %v1417_v61, 0.0 }
 0x10c   : > { %v1567_v25 = vadd.f32 %v1561_v39, %v3262_v45  ;;  %v1652_v54 = vadd.f32 %v1646_v42, %v3103_v48  ;;  %v1748_v60 = vmul.f32 %v3129_v1, %v3306_v40  ;;  %v1316_v35 = vadd.f32 %v1310_v13, %v1283_v49 }
 0x10d   : > { %v3412_v8 = vpop.f32.mrf.mxu2  ;;  %v1579_v4 = vmul.f32 %v3144_v9, %v3312_v62  ;;  %v1427_v38 = vpack.c.bf16 %v1423_v28, %v1422_v18  ;;  %v1311_v44 = vmul.f32 %v3400_v31, %v3379_v63  ;;  %v1499_v53 = vadd.f32 %v1493_v12, %v1481_v56 }
 0x10e   : > { %v3423_v27 = vpop.f32.mrf.mxu3  ;;  %v624_v3 = vpop.f32.mrf.mxu0  ;;  %v3438_v24 = vadd.f32 %v1578_v52, %v1566_v5  ;;  %v3440_v45 = vadd.f32 %v1663_v7, %v1651_v51  ;;  %v1400_v16 = vadd.f32 %v1394_v50, %v1382_v14  ;;  %v1322_v39 = vmax.f32 %v1316_v35, 0.0 }
 0x10f   : > { %v642_v30 = vpop.f32.mrf.mxu1  ;;  %v1494_v3 = vmul.f32 %v3195_v46, %v3312_v62  ;;  %2450 = vst [vmem:[%s3330_s26 + $0x20] sm:$0xff] %v1427_v38  ;;  %v1317_v40 = vadd.f32 %v1311_v44, %v1284_v23  ;;  %v1395_v49 = vmul.f32 %v3316_v15, %v3379_v63  ;;  %v1412_v42 = vmul.f32 %v3400_v31, %v3412_v8 }
 0x110   : > { %v3448_v18 = vadd.f32 %v1748_v60, %v3103_v48  ;;  %v1664_v12 = vmul.f32 %v3123_v0, %v3312_v62  ;;  %v1749_v51 = vmul.f32 %v3129_v1, %v3312_v62  ;;  %v1477_v14 = vmul.f32 %v3186_v41, %v3314_v10 }
 0x111   : > { %v1500_v35 = vadd.f32 %v1494_v3, %v1482_v22  ;;  %v3456_v23 = vadd.f32 %v1579_v4, %v1567_v25  ;;  %v1323_v61 = vmax.f32 %v1317_v40, 0.0  ;;  %v1418_v52 = vadd.f32 %v1412_v42, %v1400_v16 }
 0x112   : > { %v1562_v13 = vmul.f32 %v3147_v11, %v3314_v10  ;;  %v1647_v50 = vmul.f32 %v3117_v59, %v3314_v10  ;;  %v1478_v56 = vmul.f32 %v3186_v41, %v3320_v47  ;;  %v1563_v62 = vmul.f32 %v3147_v11, %v3320_v47 }
 0x113   : > { %v1648_v28 = vmul.f32 %v3117_v59, %v3320_v47  ;;  %v1326_v30 = vpack.c.bf16 %v1323_v61, %v1322_v39  ;;  %v1401_v25 = vadd.f32 %v1395_v49, %v3386_v21  ;;  %v1413_v60 = vmul.f32 %v3400_v31, %v3423_v27 }
 0x114   : > { %v3475_v10 = vadd.f32 %v1664_v12, %v1652_v54  ;;  %v3478_v4 = vadd.f32 %v1749_v51, %v3103_v48  ;;  %v1483_v38 = vadd.f32 %v1477_v14, %v3297_v32  ;;  %v1495_v44 = vmul.f32 %v3257_v6, %v3361_v55 }
 0x115   : > { %v691_v7 = vpop.f32.mrf.mxu2  ;;  %v1580_v47 = vmul.f32 %v3186_v41, %v3361_v55  ;;  %1329 = vst [vmem:[%s3330_s26 + $0x10] sm:$0xff] %v1326_v30  ;;  %v1424_v21 = vmax.f32 %v1418_v52, 0.0  ;;  %v1419_v16 = vadd.f32 %v1413_v60, %v1401_v25  ;;  %v1568_v54 = vadd.f32 %v1562_v13, %v3300_v33 }
 0x116   : > { %v709_v5 = vpop.f32.mrf.mxu3  ;;  %v3466_v22 = vpop.f32.mrf.mxu0  ;;  %v1653_v40 = vadd.f32 %v1647_v50, %v3113_v57  ;;  %v1484_v49 = vadd.f32 %v1478_v56, %v3322_v19  ;;  %v1569_v32 = vadd.f32 %v1563_v62, %v3336_v20  ;;  %v1654_v42 = vadd.f32 %v1648_v28, %v3113_v57 }
 0x117   : > { %v3473_v3 = vpop.f32.mrf.mxu1  ;;  %v1511_v39 = vmul.f32 %v3248_v37, %v3466_v22  ;;  %v1425_v12 = vmax.f32 %v1419_v16, 0.0  ;;  %v1596_v14 = vmul.f32 %v3195_v46, %v3466_v22  ;;  %v1501_v61 = vadd.f32 %v1495_v44, %v1483_v38  ;;  %v3997_v16 = vld [vmem:[#allocation16_spill] sm:$0xff] }
 0x118   : > { %v1665_v52 = vmul.f32 %v3147_v11, %v3361_v55  ;;  %v1750_v33 = vmul.f32 %v3117_v59, %v3361_v55  ;;  %v1512_v19 = vmul.f32 %v3248_v37, %v3473_v3  ;;  %v1586_v7 = vadd.f32 %v1580_v47, %v1568_v54 }
 0x119   : > { %v1517_v51 = vadd.f32 %v1511_v39, %v1499_v53  ;;  %v1496_v20 = vmul.f32 %v3257_v6, %v3370_v17  ;;  %v1581_v53 = vmul.f32 %v3186_v41, %v3370_v17  ;;  %v1428_v13 = vpack.c.bf16 %v1425_v12, %v1424_v21 }
 0x11a   : > { %v1666_v56 = vmul.f32 %v3147_v11, %v3370_v17  ;;  %v1518_v5 = vadd.f32 %v1512_v19, %v1500_v35  ;;  %v1597_v55 = vmul.f32 %v3195_v46, %v3473_v3  ;;  %v1751_v25 = vmul.f32 %v3117_v59, %v3370_v17 }
 0x11b   : > { %v1523_v62 = vmax.f32 %v1517_v51, 0.0  ;;  %v1479_v60 = vmul.f32 %v3246_v36, %v3372_v34  ;;  %2451 = vst [vmem:[%s3330_s26 + $0x28] sm:$0xff] %v1428_v13  ;;  %v1602_v38 = vadd.f32 %v1596_v14, %v3438_v24  ;;  %v3525_v47 = vadd.f32 %v1665_v52, %v1653_v40  ;;  %v3998_v51 = vld [vmem:[#allocation15_spill] sm:$0xff] }
 0x11c   : > { %v3528_v21 = vadd.f32 %v1750_v33, %v3113_v57  ;;  %v1564_v39 = vmul.f32 %v3997_v16, %v3372_v34  ;;  %v1524_v17 = vmax.f32 %v1518_v5, 0.0  ;;  %v1502_v54 = vadd.f32 %v1496_v20, %v1484_v49 }
 0x11d   : > { %v3505_v50 = vpop.f32.mrf.mxu2  ;;  %v1587_v12 = vadd.f32 %v1581_v53, %v1569_v32  ;;  %v1649_v24 = vmul.f32 %v3998_v51, %v3372_v34  ;;  %v3534_v19 = vadd.f32 %v1666_v56, %v1654_v42  ;;  %v1603_v40 = vadd.f32 %v1597_v55, %v3456_v23 }
 0x11e   : > { %v3511_v28 = vpop.f32.mrf.mxu3  ;;  %v3513_v30 = vpop.f32.mrf.mxu0  ;;  %v1614_v44 = vmul.f32 %v3248_v37, %v3505_v50  ;;  %3996 = vst [vmem:[#allocation18_spill] sm:$0xff] %v3528_v21  ;;  %v1529_v13 = vpack.c.bf16 %v1524_v17, %v1523_v62  ;;  %v3540_v33 = vadd.f32 %v1751_v25, %v3113_v57  ;;  %v1485_v21 = vadd.f32 %v1479_v60, %v3374_v29 }
 0x11f   : > { %v3523_v35 = vpop.f32.mrf.mxu1  ;;  %v1615_v52 = vmul.f32 %v3248_v37, %v3511_v28  ;;  %v1480_v49 = vmul.f32 %v3246_v36, %v3379_v63  ;;  %v1513_v34 = vmul.f32 %v3333_v43, %v3513_v30  ;;  %v1570_v32 = vadd.f32 %v1564_v39, %v3384_v2 }
 0x120   : > { %v1620_v14 = vadd.f32 %v1614_v44, %v1602_v38  ;;  %3999 = vst [vmem:[#allocation16_spill] sm:$0xff] %v3540_v33  ;;  %v1565_v42 = vmul.f32 %v3997_v16, %v3379_v63  ;;  %v1655_v53 = vadd.f32 %v1649_v24, %v3115_v58  ;;  %v1598_v29 = vmul.f32 %v3257_v6, %v3513_v30 }
 0x121   : > { %2452 = vst [vmem:[%s3330_s26 + $0x30] sm:$0xff] %v1529_v13  ;;  %v1621_v20 = vadd.f32 %v1615_v52, %v1603_v40  ;;  %v1519_v56 = vadd.f32 %v1513_v34, %v1501_v61  ;;  %v1514_v62 = vmul.f32 %v3333_v43, %v3523_v35  ;;  %v1650_v2 = vmul.f32 %v3998_v51, %v3379_v63 }
 0x122   : > { %v1626_v23 = vmax.f32 %v1620_v14, 0.0  ;;  %v1497_v55 = vmul.f32 %v3316_v15, %v3412_v8  ;;  %v1582_v25 = vmul.f32 %v3246_v36, %v3412_v8  ;;  %v1486_v44 = vadd.f32 %v1480_v49, %v3390_v26  ;;  %v4000_v14 = vld [vmem:[#allocation17_spill] sm:$0xff] }
 0x123   : > { %v1627_v60 = vmax.f32 %v1621_v20, 0.0  ;;  %v1525_v39 = vmax.f32 %v1519_v56, 0.0  ;;  %v1520_v17 = vadd.f32 %v1514_v62, %v1502_v54  ;;  %v1599_v24 = vmul.f32 %v3257_v6, %v3523_v35 }
 0x124   : > { %v1571_v13 = vadd.f32 %v1565_v42, %v4000_v14  ;;  %v1667_v40 = vmul.f32 %v3997_v16, %v3412_v8  ;;  %v1752_v52 = vmul.f32 %v3998_v51, %v3412_v8  ;;  %v1498_v26 = vmul.f32 %v3316_v15, %v3423_v27 }
 0x125   : > { %v3556_v5 = vpop.f32.mrf.mxu2  ;;  %v1632_v34 = vpack.c.bf16 %v1627_v60, %v1626_v23  ;;  %v1604_v49 = vadd.f32 %v1598_v29, %v1586_v7  ;;  %v1526_v20 = vmax.f32 %v1520_v17, 0.0  ;;  %v1656_v56 = vadd.f32 %v1650_v2, %v3115_v58 }
 0x126   : > { %v3564_v38 = vpop.f32.mrf.mxu3  ;;  %v3566_v61 = vpop.f32.mrf.mxu0  ;;  %v1616_v54 = vmul.f32 %v3333_v43, %v3556_v5  ;;  %v1503_v62 = vadd.f32 %v1497_v55, %v1485_v21  ;;  %v1588_v42 = vadd.f32 %v1582_v25, %v1570_v32  ;;  %v1583_v14 = vmul.f32 %v3246_v36, %v3423_v27 }
 0x127   : > { %v3571_v63 = vpop.f32.mrf.mxu1  ;;  %2455 = vst [vmem:[%s3330_s26 + $0x48] sm:$0xff] %v1632_v34  ;;  %v1530_v33 = vpack.c.bf16 %v1526_v20, %v1525_v39  ;;  %v1605_v8 = vadd.f32 %v1599_v24, %v1587_v12  ;;  %v1617_v60 = vmul.f32 %v3333_v43, %v3564_v38  ;;  %v3588_v7 = vadd.f32 %v1667_v40, %v1655_v53 }
 0x128   : > { %v1622_v23 = vadd.f32 %v1616_v54, %v1604_v49  ;;  %v3591_v29 = vadd.f32 %v1752_v52, %v3115_v58  ;;  %v1668_v2 = vmul.f32 %v3997_v16, %v3423_v27  ;;  %v1753_v21 = vmul.f32 %v3998_v51, %v3423_v27 }
 0x129   : > { %v1504_v32 = vadd.f32 %v1498_v26, %v1486_v44  ;;  %2453 = vst [vmem:[%s3330_s26 + $0x38] sm:$0xff] %v1530_v33  ;;  %v1623_v25 = vadd.f32 %v1617_v60, %v1605_v8  ;;  %v1515_v12 = vmul.f32 %v3400_v31, %v3566_v61  ;;  %v1589_v53 = vadd.f32 %v1583_v14, %v1571_v13 }
 0x12a   : > { %v1628_v55 = vmax.f32 %v1622_v23, 0.0  ;;  %v1681_v17 = vmul.f32 %v3144_v9, %v3466_v22  ;;  %v1600_v24 = vmul.f32 %v3316_v15, %v3566_v61  ;;  %v1516_v40 = vmul.f32 %v3400_v31, %v3571_v63 }
 0x12b   : > { %v1766_v44 = vmul.f32 %v3123_v0, %v3466_v22  ;;  %v1851_v52 = vmul.f32 %v3129_v1, %v3466_v22  ;;  %v1629_v34 = vmax.f32 %v1623_v25, 0.0  ;;  %v1521_v13 = vadd.f32 %v1515_v12, %v1503_v62 }
 0x12c   : > { %v3614_v49 = vadd.f32 %v1668_v2, %v1656_v56  ;;  %v3617_v20 = vadd.f32 %v1753_v21, %v3115_v58  ;;  %v1682_v54 = vmul.f32 %v3144_v9, %v3473_v3  ;;  %v1522_v14 = vadd.f32 %v1516_v40, %v1504_v32 }
 0x12d   : > { %v3600_v39 = vpop.f32.mrf.mxu2  ;;  %v1767_v8 = vmul.f32 %v3123_v0, %v3473_v3  ;;  %v1633_v23 = vpack.c.bf16 %v1629_v34, %v1628_v55  ;;  %v1527_v60 = vmax.f32 %v1521_v13, 0.0  ;;  %v1601_v22 = vmul.f32 %v3316_v15, %v3571_v63 }
 0x12e   : > { %v3608_v27 = vpop.f32.mrf.mxu3  ;;  %v758_v33 = vpop.f32.mrf.mxu0  ;;  %v1852_v56 = vmul.f32 %v3129_v1, %v3473_v3  ;;  %v1606_v62 = vadd.f32 %v1600_v24, %v1588_v42  ;;  %v1528_v2 = vmax.f32 %v1522_v14, 0.0  ;;  %v1618_v21 = vmul.f32 %v3400_v31, %v3600_v39 }
 0x12f   : > { %v776_v26 = vpop.f32.mrf.mxu1  ;;  %v1687_v25 = vadd.f32 %v1681_v17, %v3440_v45  ;;  %v1772_v32 = vadd.f32 %v1766_v44, %v3448_v18  ;;  %v3632_v12 = vadd.f32 %v1851_v52, %v3103_v48  ;;  %v1699_v55 = vmul.f32 %v3195_v46, %v3505_v50  ;;  %2456 = vst [vmem:[%s3330_s26 + $0x50] sm:$0xff] %v1633_v23 }
 0x130   : > { %v1688_v40 = vadd.f32 %v1682_v54, %v3475_v10  ;;  %v1700_v3 = vmul.f32 %v3195_v46, %v3511_v28  ;;  %v1531_v42 = vpack.c.bf16 %v1528_v2, %v1527_v60  ;;  %v1624_v24 = vadd.f32 %v1618_v21, %v1606_v62 }
 0x131   : > { %v1773_v33 = vadd.f32 %v1767_v8, %v3478_v4  ;;  %v1784_v45 = vmul.f32 %v3144_v9, %v3505_v50  ;;  %v1607_v18 = vadd.f32 %v1601_v22, %v1589_v53  ;;  %v1619_v17 = vmul.f32 %v3400_v31, %v3608_v27 }
 0x132   : > { %v3646_v52 = vadd.f32 %v1852_v56, %v3103_v48  ;;  %v3650_v10 = vmul.f32 %v3123_v0, %v3505_v50  ;;  %v3654_v34 = vmul.f32 %v3129_v1, %v3505_v50  ;;  %v1683_v4 = vmul.f32 %v3186_v41, %v3513_v30  ;;  %2454 = vst [vmem:[%s3330_s26 + $0x40] sm:$0xff] %v1531_v42 }
 0x133   : > { %v1630_v26 = vmax.f32 %v1624_v24, 0.0  ;;  %v1625_v54 = vadd.f32 %v1619_v17, %v1607_v18  ;;  %v1705_v14 = vadd.f32 %v1699_v55, %v1687_v25  ;;  %v1785_v60 = vmul.f32 %v3144_v9, %v3511_v28 }
 0x134   : > { %v3669_v50 = vmul.f32 %v3123_v0, %v3511_v28  ;;  %v1706_v22 = vadd.f32 %v1700_v3, %v1688_v40  ;;  %v1768_v62 = vmul.f32 %v3147_v11, %v3513_v30  ;;  %v1853_v2 = vmul.f32 %v3117_v59, %v3513_v30 }
 0x135   : > { %v825_v44 = vpop.f32.mrf.mxu2  ;;  %v1631_v21 = vmax.f32 %v1625_v54, 0.0  ;;  %v3679_v55 = vmul.f32 %v3129_v1, %v3511_v28  ;;  %v1689_v42 = vadd.f32 %v1683_v4, %v3525_v47  ;;  %v1684_v24 = vmul.f32 %v3186_v41, %v3523_v35  ;;  %v4001_v4 = vld [vmem:[#allocation18_spill] sm:$0xff] }
 0x136   : > { %v843_v53 = vpop.f32.mrf.mxu3  ;;  %v3659_v13 = vpop.f32.mrf.mxu0  ;;  %v1769_v44 = vmul.f32 %v3147_v11, %v3523_v35  ;;  %v1701_v1 = vmul.f32 %v3257_v6, %v3556_v5  ;;  %v1790_v47 = vadd.f32 %v1784_v45, %v1772_v32  ;;  %v3694_v54 = vadd.f32 %v1853_v2, %v3113_v57 }
 0x137   : > { %v1717_v8 = vmul.f32 %v3248_v37, %v3659_v13  ;;  %v3663_v23 = vpop.f32.mrf.mxu1  ;;  %v1802_v40 = vmul.f32 %v3195_v46, %v3659_v13  ;;  %v1634_v18 = vpack.c.bf16 %v1631_v21, %v1630_v26  ;;  %v1774_v53 = vadd.f32 %v1768_v62, %v4001_v4 }
 0x138   : > { %v1718_v56 = vmul.f32 %v3248_v37, %v3663_v23  ;;  %v1803_v30 = vmul.f32 %v3195_v46, %v3663_v23  ;;  %v1854_v26 = vmul.f32 %v3117_v59, %v3523_v35  ;;  %v1690_v2 = vadd.f32 %v1684_v24, %v3534_v19 }
 0x139   : > { %v1723_v25 = vadd.f32 %v1717_v8, %v1705_v14  ;;  %2457 = vst [vmem:[%s3330_s26 + $0x58] sm:$0xff] %v1634_v18  ;;  %v1791_v8 = vadd.f32 %v1785_v60, %v1773_v33  ;;  %v1808_v21 = vadd.f32 %v1802_v40, %v1790_v47  ;;  %v1702_v35 = vmul.f32 %v3257_v6, %v3564_v38 }
 0x13a   : > { %v1724_v3 = vadd.f32 %v1718_v56, %v1706_v22  ;;  %v1786_v22 = vmul.f32 %v3186_v41, %v3556_v5  ;;  %v3721_v47 = vadd.f32 %v1854_v26, %v3113_v57  ;;  %v3725_v19 = vmul.f32 %v3147_v11, %v3556_v5 }
 0x13b   : > { %v1729_v17 = vmax.f32 %v1723_v25, 0.0  ;;  %v1809_v25 = vadd.f32 %v1803_v30, %v1791_v8  ;;  %v3729_v24 = vmul.f32 %v3117_v59, %v3556_v5  ;;  %v1685_v26 = vmul.f32 %v3246_v36, %v3566_v61 }
 0x13c   : > { %v1730_v28 = vmax.f32 %v1724_v3, 0.0  ;;  %v4002_v3 = vld [vmem:[#allocation16_spill] sm:$0xff]  ;;  %v3741_v5 = vmul.f32 %v3147_v11, %v3564_v38 }
 0x13d   : > { %v3699_v14 = vpop.f32.mrf.mxu2  ;;  %v1775_v40 = vadd.f32 %v1769_v44, %v4002_v3  ;;  %v1787_v44 = vmul.f32 %v3186_v41, %v3564_v38 }
 0x13e   : > { %v1735_v56 = vpack.c.bf16 %v1730_v28, %v1729_v17  ;;  %v1820_v32 = vmul.f32 %v3248_v37, %v3699_v14  ;;  %v3705_v45 = vpop.f32.mrf.mxu3  ;;  %v3707_v62 = vpop.f32.mrf.mxu0  ;;  %v1707_v17 = vadd.f32 %v1701_v1, %v1689_v42  ;;  %4003 = vst [vmem:[#allocation15_spill] sm:$0xff] %v3741_v5  ;;  %v1788_v5 = vmul.f32 %v3246_v36, %v3600_v39 }
 0x13f   : > { %v1821_v33 = vmul.f32 %v3248_v37, %v3705_v45  ;;  %v3714_v60 = vpop.f32.mrf.mxu1  ;;  %v1719_v28 = vmul.f32 %v3333_v43, %v3707_v62  ;;  %v1804_v1 = vmul.f32 %v3257_v6, %v3707_v62 }
 0x140   : > { %2458 = vst [vmem:[%s3330_s26 + $0x60] sm:$0xff] %v1735_v56  ;;  %v1826_v18 = vadd.f32 %v1820_v32, %v1808_v21  ;;  %v1708_v56 = vadd.f32 %v1702_v35, %v1690_v2  ;;  %v1720_v21 = vmul.f32 %v3333_v43, %v3714_v60  ;;  %v3745_v32 = vmul.f32 %v3117_v59, %v3564_v38 }
 0x141   : > { %v1827_v30 = vadd.f32 %v1821_v33, %v1809_v25  ;;  %v1725_v42 = vadd.f32 %v1719_v28, %v1707_v17  ;;  %v1770_v25 = vmul.f32 %v3997_v16, %v3566_v61  ;;  %v1792_v33 = vadd.f32 %v1786_v22, %v1774_v53 }
 0x142   : > { %v1832_v4 = vmax.f32 %v1826_v18, 0.0  ;;  %4004 = vst [vmem:[#allocation17_spill] sm:$0xff] %v3745_v32  ;;  %v1726_v17 = vadd.f32 %v1720_v21, %v1708_v56  ;;  %v1805_v2 = vmul.f32 %v3257_v6, %v3714_v60  ;;  %v1855_v28 = vmul.f32 %v3998_v51, %v3566_v61 }
 0x143   : > { %v1833_v8 = vmax.f32 %v1827_v30, 0.0  ;;  %v1731_v18 = vmax.f32 %v1725_v42, 0.0  ;;  %v1686_v59 = vmul.f32 %v3246_v36, %v3571_v63  ;;  %v1810_v38 = vadd.f32 %v1804_v1, %v1792_v33 }
 0x144   : > { %v1691_v22 = vadd.f32 %v1685_v26, %v3588_v7  ;;  %v1732_v42 = vmax.f32 %v1726_v17, 0.0  ;;  %v1793_v61 = vadd.f32 %v1787_v44, %v1775_v40  ;;  %v1771_v1 = vmul.f32 %v3997_v16, %v3571_v63 }
 0x145   : > { %v1838_v3 = vpack.c.bf16 %v1833_v8, %v1832_v4  ;;  %v3751_v35 = vpop.f32.mrf.mxu2  ;;  %v1703_v4 = vmul.f32 %v3316_v15, %v3600_v39  ;;  %v1856_v56 = vmul.f32 %v3998_v51, %v3571_v63  ;;  %v1776_v7 = vadd.f32 %v1770_v25, %v3591_v29 }
 0x146   : > { %v1822_v30 = vmul.f32 %v3333_v43, %v3751_v35  ;;  %v3759_v32 = vpop.f32.mrf.mxu3  ;;  %v3761_v53 = vpop.f32.mrf.mxu0  ;;  %v1704_v26 = vmul.f32 %v3316_v15, %v3608_v27  ;;  %v1811_v17 = vadd.f32 %v1805_v2, %v1793_v61  ;;  %v3779_v40 = vadd.f32 %v1855_v28, %v3115_v58 }
 0x147   : > { %2461 = vst [vmem:[%s3330_s26 + $0x78] sm:$0xff] %v1838_v3  ;;  %v3767_v8 = vpop.f32.mrf.mxu1  ;;  %v1823_v33 = vmul.f32 %v3333_v43, %v3759_v32  ;;  %v1736_v3 = vpack.c.bf16 %v1732_v42, %v1731_v18  ;;  %v1692_v44 = vadd.f32 %v1686_v59, %v3614_v49  ;;  %v3786_v63 = vmul.f32 %v3997_v16, %v3600_v39 }
 0x148   : > { %v1828_v21 = vadd.f32 %v1822_v30, %v1810_v38  ;;  %v1709_v25 = vadd.f32 %v1703_v4, %v1691_v22  ;;  %v1721_v18 = vmul.f32 %v3400_v31, %v3761_v53  ;;  %v1777_v2 = vadd.f32 %v1771_v1, %v3617_v20 }
 0x149   : > { %2459 = vst [vmem:[%s3330_s26 + $0x68] sm:$0xff] %v1736_v3  ;;  %v1829_v29 = vadd.f32 %v1823_v33, %v1811_v17  ;;  %v3793_v28 = vadd.f32 %v1856_v56, %v3115_v58  ;;  %v1789_v49 = vmul.f32 %v3246_v36, %v3608_v27  ;;  %v1806_v59 = vmul.f32 %v3316_v15, %v3761_v53 }
 0x14a   : > { %v1834_v38 = vmax.f32 %v1828_v21, 0.0  ;;  %v1727_v42 = vadd.f32 %v1721_v18, %v1709_v25  ;;  %v1710_v61 = vadd.f32 %v1704_v26, %v1692_v44  ;;  %v1722_v22 = vmul.f32 %v3400_v31, %v3767_v8 }
 0x14b   : > { %v1835_v30 = vmax.f32 %v1829_v29, 0.0  ;;  %v3805_v20 = vmul.f32 %v3998_v51, %v3600_v39  ;;  %v3809_v1 = vmul.f32 %v3997_v16, %v3608_v27  ;;  %v1887_v56 = vmul.f32 %v3144_v9, %v3659_v13 }
 0x14c   : > { %v1807_v21 = vmul.f32 %v3316_v15, %v3767_v8  ;;  %v1733_v17 = vmax.f32 %v1727_v42, 0.0  ;;  %v1728_v44 = vadd.f32 %v1722_v22, %v1710_v61  ;;  %v1794_v29 = vadd.f32 %v1788_v5, %v1776_v7 }
 0x14d   : > { %v3801_v4 = vpop.f32.mrf.mxu2  ;;  %4005 = vst [vmem:[#allocation18_spill] sm:$0xff] %v3805_v20  ;;  %v1839_v3 = vpack.c.bf16 %v1835_v30, %v1834_v38  ;;  %v1972_v25 = vmul.f32 %v3123_v0, %v3659_v13  ;;  %v1888_v18 = vmul.f32 %v3144_v9, %v3663_v23  ;;  %v1973_v20 = vmul.f32 %v3123_v0, %v3663_v23 }
 0x14e   : > { %v3815_v33 = vpop.f32.mrf.mxu3  ;;  %v892_v26 = vpop.f32.mrf.mxu0  ;;  %v1824_v58 = vmul.f32 %v3400_v31, %v3801_v4  ;;  %v1734_v38 = vmax.f32 %v1728_v44, 0.0  ;;  %v1812_v30 = vadd.f32 %v1806_v59, %v1794_v29  ;;  %v1795_v5 = vadd.f32 %v1789_v49, %v1777_v2 }
 0x14f   : > { %v910_v39 = vpop.f32.mrf.mxu1  ;;  %v1875_v26 = vadd.f32 %v3650_v10, %v3632_v12  ;;  %2462 = vst [vmem:[%s3330_s26 + $0x80] sm:$0xff] %v1839_v3  ;;  %v1905_v13 = vmul.f32 %v3195_v46, %v3699_v14  ;;  %v1960_v7 = vadd.f32 %v3654_v34, %v3103_v48  ;;  %v1876_v0 = vadd.f32 %v3669_v50, %v3646_v52 }
 0x150   : > { %v1825_v23 = vmul.f32 %v3400_v31, %v3815_v33  ;;  %v1906_v12 = vmul.f32 %v3195_v46, %v3705_v45  ;;  %v1737_v10 = vpack.c.bf16 %v1734_v38, %v1733_v17  ;;  %v1830_v42 = vadd.f32 %v1824_v58, %v1812_v30 }
 0x151   : > { %v1813_v59 = vadd.f32 %v1807_v21, %v1795_v5  ;;  %v3840_v2 = vmul.f32 %v3998_v51, %v3608_v27  ;;  %v1893_v49 = vadd.f32 %v1887_v56, %v1875_v26  ;;  %v1978_v61 = vadd.f32 %v1972_v25, %v1960_v7 }
 0x152   : > { %v1961_v34 = vadd.f32 %v3679_v55, %v3103_v48  ;;  %v1990_v52 = vmul.f32 %v3144_v9, %v3699_v14  ;;  %v1894_v50 = vadd.f32 %v1888_v18, %v1876_v0  ;;  %2460 = vst [vmem:[%s3330_s26 + $0x70] sm:$0xff] %v1737_v10  ;;  %v1836_v22 = vmax.f32 %v1830_v42, 0.0 }
 0x153   : > { %v1831_v3 = vadd.f32 %v1825_v23, %v1813_v59  ;;  %v1991_v58 = vmul.f32 %v3144_v9, %v3705_v45  ;;  %v1889_v51 = vmul.f32 %v3186_v41, %v3707_v62  ;;  %v1974_v27 = vmul.f32 %v3147_v11, %v3707_v62 }
 0x154   : > { %v1979_v17 = vadd.f32 %v1973_v20, %v1961_v34  ;;  %v1911_v55 = vadd.f32 %v1905_v13, %v1893_v49  ;;  %v1912_v21 = vadd.f32 %v1906_v12, %v1894_v50  ;;  %v1890_v20 = vmul.f32 %v3186_v41, %v3714_v60  ;;  %v4007_v50 = vld [vmem:[#allocation17_spill] sm:$0xff] }
 0x155   : > { %v959_v44 = vpop.f32.mrf.mxu2  ;;  %v1837_v14 = vmax.f32 %v1831_v3, 0.0  ;;  %v1877_v9 = vadd.f32 %v3725_v19, %v3694_v54  ;;  %v1962_v45 = vadd.f32 %v3729_v24, %v3113_v57  ;;  %v1907_v25 = vmul.f32 %v3257_v6, %v3751_v35  ;;  %v4006_v54 = vld [vmem:[#allocation15_spill] sm:$0xff] }
 0x156   : > { %v977_v56 = vpop.f32.mrf.mxu3  ;;  %v1019_v48 = vpop.f32.mrf.mxu0  ;;  %v1992_v18 = vmul.f32 %v3186_v41, %v3751_v35  ;;  %v1878_v19 = vadd.f32 %v4006_v54, %v3721_v47  ;;  %v1908_v24 = vmul.f32 %v3257_v6, %v3759_v32  ;;  %v1996_v12 = vadd.f32 %v1990_v52, %v1978_v61 }
 0x157   : > { %v1923_v29 = vmul.f32 %v3248_v37, %v1019_v48  ;;  %v1037_v39 = vpop.f32.mrf.mxu1  ;;  %v1840_v26 = vpack.c.bf16 %v1837_v14, %v1836_v22  ;;  %v1895_v30 = vadd.f32 %v1889_v51, %v1877_v9  ;;  %v1980_v5 = vadd.f32 %v1974_v27, %v1962_v45 }
 0x158   : > { %v1924_v62 = vmul.f32 %v3248_v37, %v1037_v39  ;;  %v2008_v13 = vmul.f32 %v3195_v46, %v1019_v48  ;;  %v2009_v23 = vmul.f32 %v3195_v46, %v1037_v39  ;;  %v1997_v10 = vadd.f32 %v1991_v58, %v1979_v17 }
 0x159   : > { %v1929_v38 = vadd.f32 %v1923_v29, %v1911_v55  ;;  %2463 = vst [vmem:[%s3330_s26 + $0x88] sm:$0xff] %v1840_v26  ;;  %v1975_v35 = vmul.f32 %v3147_v11, %v3714_v60  ;;  %v1913_v59 = vadd.f32 %v1907_v25, %v1895_v30  ;;  %v1998_v49 = vadd.f32 %v1992_v18, %v1980_v5  ;;  %v4008_v30 = vld [vmem:[#allocation14_spill] sm:$0xff] }
 0x15a   : > { %v1930_v7 = vadd.f32 %v1924_v62, %v1912_v21  ;;  %v1896_v34 = vadd.f32 %v1890_v20, %v1878_v19  ;;  %v1963_v47 = vadd.f32 %v4007_v50, %v3113_v57  ;;  %v1993_v3 = vmul.f32 %v3186_v41, %v3759_v32  ;;  %v4009_v5 = vld [vmem:[#allocation18_spill] sm:$0xff] }
 0x15b   : > { %v1935_v0 = vmax.f32 %v1929_v38, 0.0  ;;  %v2014_v44 = vadd.f32 %v2008_v13, %v1996_v12  ;;  %v2015_v11 = vadd.f32 %v2009_v23, %v1997_v10  ;;  %v1891_v57 = vmul.f32 %v3246_v36, %v3761_v53 }
 0x15c   : > { %v1936_v42 = vmax.f32 %v1930_v7, 0.0  ;;  %v1914_v17 = vadd.f32 %v1908_v24, %v1896_v34  ;;  %v1981_v56 = vadd.f32 %v1975_v35, %v1963_v47  ;;  %v1976_v32 = vmul.f32 %v3997_v16, %v3761_v53 }
 0x15d   : > { %v1086_v22 = vpop.f32.mrf.mxu2  ;;  %v1892_v55 = vmul.f32 %v3246_v36, %v3767_v8  ;;  %v1909_v9 = vmul.f32 %v3316_v15, %v3801_v4  ;;  %v1880_v18 = vadd.f32 %v3809_v1, %v3793_v28  ;;  %v1977_v26 = vmul.f32 %v3997_v16, %v3767_v8 }
 0x15e   : > { %v1941_v51 = vpack.c.bf16 %v1936_v42, %v1935_v0  ;;  %v2026_v46 = vmul.f32 %v3248_v37, %v1086_v22  ;;  %v1104_v61 = vpop.f32.mrf.mxu3  ;;  %v1021_v52 = vpop.f32.mrf.mxu0  ;;  %v1999_v25 = vadd.f32 %v1993_v3, %v1981_v56  ;;  %v1964_v13 = vadd.f32 %v4009_v5, %v4008_v30 }
 0x15f   : > { %v2027_v60 = vmul.f32 %v3248_v37, %v1104_v61  ;;  %v1925_v58 = vmul.f32 %v3333_v43, %v1021_v52  ;;  %v1039_v27 = vpop.f32.mrf.mxu1  ;;  %v1879_v37 = vadd.f32 %v3786_v63, %v3779_v40  ;;  %v2010_v39 = vmul.f32 %v3257_v6, %v1021_v52 }
 0x160   : > { %2464 = vst [vmem:[%s3330_s26 + $0x90] sm:$0xff] %v1941_v51  ;;  %v2032_v48 = vadd.f32 %v2026_v46, %v2014_v44  ;;  %v1926_v41 = vmul.f32 %v3333_v43, %v1039_v27  ;;  %v2011_v53 = vmul.f32 %v3257_v6, %v1039_v27  ;;  %v1910_v40 = vmul.f32 %v3316_v15, %v3815_v33 }
 0x161   : > { %v2033_v21 = vadd.f32 %v2027_v60, %v2015_v11  ;;  %v1931_v14 = vadd.f32 %v1925_v58, %v1913_v59  ;;  %v1897_v38 = vadd.f32 %v1891_v57, %v1879_v37  ;;  %v1898_v6 = vadd.f32 %v1892_v55, %v1880_v18 }
 0x162   : > { %v2038_v29 = vmax.f32 %v2032_v48, 0.0  ;;  %v1932_v20 = vadd.f32 %v1926_v41, %v1914_v17  ;;  %v2016_v19 = vadd.f32 %v2010_v39, %v1998_v49  ;;  %v2017_v12 = vadd.f32 %v2011_v53, %v1999_v25 }
 0x163   : > { %v2039_v45 = vmax.f32 %v2033_v21, 0.0  ;;  %v1937_v62 = vmax.f32 %v1931_v14, 0.0  ;;  %v1915_v23 = vadd.f32 %v1909_v9, %v1897_v38  ;;  %v1916_v35 = vadd.f32 %v1910_v40, %v1898_v6 }
 0x164   : > { %v1938_v63 = vmax.f32 %v1932_v20, 0.0  ;;  %v1965_v42 = vadd.f32 %v3840_v2, %v4008_v30  ;;  %v1994_v34 = vmul.f32 %v3246_v36, %v3801_v4  ;;  %v1995_v50 = vmul.f32 %v3246_v36, %v3815_v33 }
 0x165   : > { %v2044_v7 = vpack.c.bf16 %v2039_v45, %v2038_v29  ;;  %v1088_v54 = vpop.f32.mrf.mxu2 }
 0x166   : > { %v1942_v24 = vpack.c.bf16 %v1938_v63, %v1937_v62  ;;  %v2028_v28 = vmul.f32 %v3333_v43, %v1088_v54  ;;  %v1106_v1 = vpop.f32.mrf.mxu3  ;;  %v1024_v0 = vpop.f32.mrf.mxu0  ;;  %v1983_v3 = vadd.f32 %v1977_v26, %v1965_v42 }
 0x167   : > { %2467 = vst [vmem:[%s3330_s26 + $0xa8] sm:$0xff] %v2044_v7  ;;  %v2029_v16 = vmul.f32 %v3333_v43, %v1106_v1  ;;  %v1927_v8 = vmul.f32 %v3400_v31, %v1024_v0  ;;  %v1042_v10 = vpop.f32.mrf.mxu1  ;;  %v1982_v43 = vadd.f32 %v1976_v32, %v1964_v13  ;;  %v2012_v61 = vmul.f32 %v3316_v15, %v1024_v0 }
 0x168   : > { %2465 = vst [vmem:[%s3330_s26 + $0x98] sm:$0xff] %v1942_v24  ;;  %v2034_v59 = vadd.f32 %v2028_v28, %v2016_v19  ;;  %v1928_v49 = vmul.f32 %v3400_v31, %v1042_v10  ;;  %v2013_v52 = vmul.f32 %v3316_v15, %v1042_v10  ;;  %v2001_v36 = vadd.f32 %v1995_v50, %v1983_v3 }
 0x169   : > { %v2035_v47 = vadd.f32 %v2029_v16, %v2017_v12  ;;  %v1933_v22 = vadd.f32 %v1927_v8, %v1915_v23  ;;  %v2000_v4 = vadd.f32 %v1994_v34, %v1982_v43 }
 0x16a   : > { %v2040_v44 = vmax.f32 %v2034_v59, 0.0  ;;  %v1934_v51 = vadd.f32 %v1928_v49, %v1916_v35  ;;  %v2019_v56 = vadd.f32 %v2013_v52, %v2001_v36 }
 0x16b   : > { %v2041_v46 = vmax.f32 %v2035_v47, 0.0  ;;  %v1939_v2 = vmax.f32 %v1933_v22, 0.0  ;;  %v2018_v27 = vadd.f32 %v2012_v61, %v2000_v4 }
 0x16c   : > { %v1940_v17 = vmax.f32 %v1934_v51, 0.0 }
 0x16d   : > { %v2045_v33 = vpack.c.bf16 %v2041_v46, %v2040_v44  ;;  %v1091_v60 = vpop.f32.mrf.mxu2 }
 0x16e   : > { %v1943_v11 = vpack.c.bf16 %v1940_v17, %v1939_v2  ;;  %v1109_v58 = vpop.f32.mrf.mxu3  ;;  %v2030_v57 = vmul.f32 %v3400_v31, %v1091_v60  ;;  %v1026_v41 = vpop.f32.mrf.mxu0 }
 0x16f   : > { %2468 = vst [vmem:[%s3330_s26 + $0xb0] sm:$0xff] %v2045_v33  ;;  %v2031_v48 = vmul.f32 %v3400_v31, %v1109_v58  ;;  %v1044_v15 = vpop.f32.mrf.mxu1 }
 0x170   : > { %2466 = vst [vmem:[%s3330_s26 + $0xa0] sm:$0xff] %v1943_v11  ;;  %v2036_v32 = vadd.f32 %v2030_v57, %v2018_v27 }
 0x171   : > { %v2037_v55 = vadd.f32 %v2031_v48, %v2019_v56 }
 0x172   : > { %v2042_v21 = vmax.f32 %v2036_v32, 0.0 }
 0x173   : > { %v2043_v14 = vmax.f32 %v2037_v55, 0.0 }
 0x175   : > { %v2046_v37 = vpack.c.bf16 %v2043_v14, %v2042_v21  ;;  %v1093_v31 = vpop.f32.mrf.mxu2 }
 0x176   : > { %v1111_v29 = vpop.f32.mrf.mxu3 }
 0x177   : > { %2469 = vst [vmem:[%s3330_s26 + $0xb8] sm:$0xff] %v2046_v37 }
 0x178   : > { %2676 = shalt.err (!%p2673_p13)
}
 0x179   : > { %s2753_s11 = smov 128   ;;  %s2754_s29 = smov 256  }
 0x17a   : > { %s2755_s26 = smov 8  }
 0x17b   : > { %2533 = dma.vmem_to_hbm [thread:$0]  (%p2846_p9), %s2067_s30, 3072, %s2069_s9, %s2052_s10, %s2753_s11, %s2754_s29, %s2755_s26  }
 0x17c PF: > { %p2544_p0 = scmp.ge.s32.totalorder %s2747_s22, 2  ;;  %s2083_s12 = sand.u32 1, %s2719_s15  }
 0x17d   : > { %s2084_s13 = scalar_lea.sflag [#allocation5], %s2083_s12 }
 0x17e   : > { %p2540_p1 = pnand %p2544_p0, %p2852_p12 }
 0x180   : > { %p2541_p2 = pneg %p2540_p1 }
 0x182   : > { %2714 = dma.done.wait (%p2541_p2), %s2084_s13, 3072  }
 0x183   : > { %2716 = vsyncadd (%p2541_p2), %s2084_s13, 4294964224  ;;  %s20_s22 = sadd.s32 1, %s2747_s22   ;;  %s4010_s18 = sld [smem:[#allocation13_spill]] }
 0x184   : > { %p17_p3 = scmp.ge.s32.totalorder %s20_s22, 6   ;;  %s4011_s5 = sld [smem:[#allocation9_spill]] }
 0x185   : > { %s4012_s19 = sld [smem:[#allocation10_spill]]  ;;  %s4015_s15 = smov %s2723_s16 }
 0x186   : > { %s4013_s20 = sld [smem:[#allocation11_spill]]  ;;  %s4016_s16 = smov %s2727_s17 }
 0x187   : > { %s4014_s21 = sld [smem:[#allocation12_spill]]  ;;  %19 = sbr.rel (!%p17_p3) target bundleno = 7 (0x7), region = 108 }
 0x189   : > { %s4017_s17 = smov %s4010_s18 }
 0x18a   : > { %s4018_s18 = smov %s4011_s5 }
 0x18c   :  { %2090 = vsyncpa [#allocation4], 1 }
 0x18d   :  { %2092 = vsyncpa [#allocation4 + $0x1], 1 }
 0x18e   :  { %2093 = vsyncpa [#allocation5], 1 }
 0x18f   :  { %2095 = vsyncpa [#allocation5 + $0x1], 1 }

</bundles_post_ra>
